<compile_context>
chip_gen: v7x
topology: tpu7x:2x2x1
jax: 0.10.0
libtpu: 0.0.40
codegen_flags: <defaults>
</compile_context>

<pallas_src>
import functools

import jax
import jax.numpy as jnp
from jax.experimental import pallas as pl
from jax.experimental.pallas import tpu as pltpu


def _elu(h):
    # ELU(alpha=1): x if x > 0 else exp(x) - 1   (exp lowers to the EUP)
    return jnp.where(h > 0, h, jnp.exp(h) - 1.0)


def c_block_kernel(x_ref, w1_ref, s1_ref, t1_ref,
                   w2_ref, s2_ref, t2_ref,
                   wfc_ref, bfc_ref, o_ref,
                   pad1_ref, buf1_ref, pad2_ref, buf2_ref, buf3_ref,
                   *, p1, p2):
    BB, T, Cin = x_ref.shape
    K = w1_ref.shape[0]
    C1 = w1_ref.shape[2]
    C2 = w2_ref.shape[2]
    T2 = wfc_ref.shape[0]
    pad = K // 2
    T1 = T // p1

    # ---------------- TC_Block 1: Conv (1,K), 'same' zero padding along time -------------
    if pad > 0:  # zero only the pad edges; interior is fully overwritten below
        pad1_ref[:, 0:pad, :] = jnp.zeros((BB, pad, Cin), jnp.float32)
        pad1_ref[:, pad + T:, :] = jnp.zeros((BB, pad, Cin), jnp.float32)
    pad1_ref[:, pad:pad + T, :] = x_ref[...]
    acc = jnp.dot(pad1_ref[:, 0:T, :].reshape(BB * T, Cin), w1_ref[0],
                  preferred_element_type=jnp.float32)
    for dk in range(1, K):
        acc = acc + jnp.dot(pad1_ref[:, dk:dk + T, :].reshape(BB * T, Cin), w1_ref[dk],
                            preferred_element_type=jnp.float32)
    buf1_ref[...] = acc                                    # (BB*T, C1), bias folded into t1

    # MaxPool (1,p1) stride p1: rows are (b, t) with t fastest and T % p1 == 0, so pool
    # groups are p1 consecutive rows -> strided Ref reads (no relayout reshape).
    g1 = (BB * T) // p1
    pooled = buf1_ref[pl.ds(0, g1, p1), :]
    for j in range(1, p1):
        pooled = jnp.maximum(pooled, buf1_ref[pl.ds(j, g1, p1), :])

    # BatchNorm (eval, folded scale/shift incl. conv bias) + ELU.  Dropout: identity (eval).
    h = _elu(pooled * s1_ref[...] + t1_ref[...])           # (BB*T1, C1)

    # ---------------- TC_Block 2 ----------------------------------------------------------
    if pad > 0:
        pad2_ref[:, 0:pad, :] = jnp.zeros((BB, pad, C1), jnp.float32)
        pad2_ref[:, pad + T1:, :] = jnp.zeros((BB, pad, C1), jnp.float32)
    pad2_ref[:, pad:pad + T1, :] = h.reshape(BB, T1, C1)
    acc2 = jnp.dot(pad2_ref[:, 0:T1, :].reshape(BB * T1, C1), w2_ref[0],
                   preferred_element_type=jnp.float32)
    for dk in range(1, K):
        acc2 = acc2 + jnp.dot(pad2_ref[:, dk:dk + T1, :].reshape(BB * T1, C1), w2_ref[dk],
                              preferred_element_type=jnp.float32)
    buf2_ref[...] = acc2                                   # (BB*T1, C2), bias folded into t2

    g2 = (BB * T1) // p2
    pooled2 = buf2_ref[pl.ds(0, g2, p2), :]
    for j in range(1, p2):
        pooled2 = jnp.maximum(pooled2, buf2_ref[pl.ds(j, g2, p2), :])

    h2 = _elu(pooled2 * s2_ref[...] + t2_ref[...])         # (BB*T2, C2), rows = (b, t2)
    buf3_ref[...] = h2

    # ---------------- flatten(start_dim=1) + Linear + softmax ------------------------------
    # torch.flatten order is channel-major / time-minor; the fc weight was pre-permuted
    # host-side to (T2, C2, N), so logits = sum_t h2[b, t, :] @ wfc[t]  (strided row reads).
    logits = jnp.dot(buf3_ref[pl.ds(0, BB, T2), :], wfc_ref[0],
                     preferred_element_type=jnp.float32)
    for t in range(1, T2):
        logits = logits + jnp.dot(buf3_ref[pl.ds(t, BB, T2), :], wfc_ref[t],
                                  preferred_element_type=jnp.float32)
    logits = logits + bfc_ref[...]

    m = jnp.max(logits, axis=-1, keepdims=True)
    e = jnp.exp(logits - m)
    o_ref[...] = (e / jnp.sum(e, axis=-1, keepdims=True)).astype(o_ref.dtype)


def c_block_forward(x, params, *, p1, p2, eps=1e-5, batch_block=None):
    """Eval-mode C_Block forward.  x: (B, Cin, 1, T); params hold PyTorch-layout arrays."""
    B, Cin, Hx, T = x.shape
    assert Hx == 1, "C_Block's fc sizing implies a height-1 input (B, Cin, 1, T)"
    w1 = params["conv1_w"]                      # (C1, Cin, 1, K)
    w2 = params["conv2_w"]                      # (C2, C1, 1, K)
    C1, _, _, K = w1.shape
    C2 = w2.shape[0]
    assert T % (p1 * p2) == 0, "seq_len must divide by p1*p2 for this kernel"
    T1, T2 = T // p1, T // (p1 * p2)
    fw = params["fc_w"]                         # (N, C2*T2)
    N = fw.shape[0]
    assert fw.shape[1] == C2 * T2
    pad = K // 2
    f32 = jnp.float32

    bb = B if batch_block is None else batch_block
    assert B % bb == 0, "batch_block must divide the batch"
    n_steps = B // bb

    # ---- host-side layout plumbing (done once; no in-kernel transposes needed) -----------
    x_t = jnp.transpose(x[:, :, 0, :], (0, 2, 1)).astype(f32)            # (B, T, Cin)
    w1_k = jnp.transpose(w1[:, :, 0, :], (2, 1, 0)).astype(f32)          # (K, Cin, C1)
    w2_k = jnp.transpose(w2[:, :, 0, :], (2, 1, 0)).astype(f32)          # (K, C1, C2)

    def bn_fold(gamma, beta, mean, var, conv_b, c):
        # BatchNorm(eval) + conv bias folded: (max + b - mean)*s + beta = max*s + (b - mean)*s + beta
        s = gamma / jnp.sqrt(var + eps)
        return (s.reshape(1, c).astype(f32),
                (beta + (conv_b - mean) * s).reshape(1, c).astype(f32))

    s1, sh1 = bn_fold(params["bn1_g"], params["bn1_b"], params["bn1_m"], params["bn1_v"],
                      params["conv1_b"], C1)
    s2, sh2 = bn_fold(params["bn2_g"], params["bn2_b"], params["bn2_m"], params["bn2_v"],
                      params["conv2_b"], C2)

    # torch.flatten index is c*T2 + t  ->  pre-permute fc weight to (T2, C2, N)
    wfc = jnp.transpose(fw.reshape(N, C2, T2), (2, 1, 0)).astype(f32)
    bfc = params["fc_b"].reshape(1, N).astype(f32)

    grid_spec = pltpu.PrefetchScalarGridSpec(
        num_scalar_prefetch=0,
        grid=(n_steps,),                               # batch chunks; 1 step at demo shapes
        in_specs=[
            pl.BlockSpec((bb, T, Cin), lambda i: (i, 0, 0)),
            pl.BlockSpec((K, Cin, C1), lambda i: (0, 0, 0)),
            pl.BlockSpec((1, C1), lambda i: (0, 0)),
            pl.BlockSpec((1, C1), lambda i: (0, 0)),
            pl.BlockSpec((K, C1, C2), lambda i: (0, 0, 0)),
            pl.BlockSpec((1, C2), lambda i: (0, 0)),
            pl.BlockSpec((1, C2), lambda i: (0, 0)),
            pl.BlockSpec((T2, C2, N), lambda i: (0, 0, 0)),
            pl.BlockSpec((1, N), lambda i: (0, 0)),
        ],
        out_specs=pl.BlockSpec((bb, N), lambda i: (i, 0)),
        scratch_shapes=[
            pltpu.VMEM((bb, T + 2 * pad, Cin), f32),     # zero-padded conv1 input
            pltpu.VMEM((bb * T, C1), f32),               # conv1 output (pre-pool)
            pltpu.VMEM((bb, T1 + 2 * pad, C1), f32),     # zero-padded conv2 input
            pltpu.VMEM((bb * T1, C2), f32),              # conv2 output (pre-pool)
            pltpu.VMEM((bb * T2, C2), f32),              # flattened features
        ],
    )

    kernel = functools.partial(c_block_kernel, p1=p1, p2=p2)
    return pl.pallas_call(
        kernel,
        out_shape=jax.ShapeDtypeStruct((B, N), x.dtype),
        grid_spec=grid_spec,
        compiler_params=pltpu.CompilerParams(dimension_semantics=("parallel",)),
    )(x_t, w1_k, s1, sh1, w2_k, s2, sh2, wfc, bfc)


def c_block_ref(x, params, *, p1, p2, eps=1e-5):
    """Pure-JAX reference matching the PyTorch module in eval mode."""
    def tc_block(h, w, b, gamma, beta, mean, var, pk):
        pad = w.shape[-1] // 2
        h = jax.lax.conv_general_dilated(
            h, w, window_strides=(1, 1), padding=((0, 0), (pad, pad)),
            dimension_numbers=("NCHW", "OIHW", "NCHW"))
        h = h + b[None, :, None, None]
        Bb, C, Hh, W = h.shape
        h = h.reshape(Bb, C, Hh, W // pk, pk).max(axis=-1)          # MaxPool2d((1,pk))
        s = gamma / jnp.sqrt(var + eps)
        h = h * s[None, :, None, None] + (beta - mean * s)[None, :, None, None]
        return jax.nn.elu(h)                                         # Dropout: identity (eval)

    h = tc_block(x, params["conv1_w"], params["conv1_b"], params["bn1_g"],
                 params["bn1_b"], params["bn1_m"], params["bn1_v"], p1)
    h = tc_block(h, params["conv2_w"], params["conv2_b"], params["bn2_g"],
                 params["bn2_b"], params["bn2_m"], params["bn2_v"], p2)
    feat = h.reshape(h.shape[0], -1)                                 # torch.flatten(start_dim=1)
    logits = feat @ params["fc_w"].T + params["fc_b"]
    return jax.nn.softmax(logits, axis=1)


if __name__ == "__main__":
    # Small shapes consistent with the module: x (B, in_channels, 1, seq_len)
    B, Cin, T = 2, 4, 80
    C1, C2, NUM_CLASSES = 40, 20, 4        # conv1_size, conv2_size, num_classes
    K, P1, P2 = 5, 5, 2                    # conv kernel, p1_kern, p2_kern
    F_IN = C2 * T // (P1 * P2)

    key = jax.random.PRNGKey(0)
    ks = jax.random.split(key, 16)
    x = jax.random.normal(ks[0], (B, Cin, 1, T), dtype=jnp.float32)

    lim1 = 1.0 / (Cin * K) ** 0.5
    lim2 = 1.0 / (C1 * K) ** 0.5
    limf = 1.0 / F_IN ** 0.5
    params = {
        "conv1_w": jax.random.uniform(ks[1], (C1, Cin, 1, K), jnp.float32, -lim1, lim1),
        "conv1_b": jax.random.uniform(ks[2], (C1,), jnp.float32, -lim1, lim1),
        "bn1_g": jax.random.uniform(ks[3], (C1,), jnp.float32, 0.5, 1.5),
        "bn1_b": 0.1 * jax.random.normal(ks[4], (C1,), jnp.float32),
        "bn1_m": 0.1 * jax.random.normal(ks[5], (C1,), jnp.float32),
        "bn1_v": jax.random.uniform(ks[6], (C1,), jnp.float32, 0.5, 1.5),
        "conv2_w": jax.random.uniform(ks[7], (C2, C1, 1, K), jnp.float32, -lim2, lim2),
        "conv2_b": jax.random.uniform(ks[8], (C2,), jnp.float32, -lim2, lim2),
        "bn2_g": jax.random.uniform(ks[9], (C2,), jnp.float32, 0.5, 1.5),
        "bn2_b": 0.1 * jax.random.normal(ks[10], (C2,), jnp.float32),
        "bn2_m": 0.1 * jax.random.normal(ks[11], (C2,), jnp.float32),
        "bn2_v": jax.random.uniform(ks[12], (C2,), jnp.float32, 0.5, 1.5),
        "fc_w": jax.random.uniform(ks[13], (NUM_CLASSES, F_IN), jnp.float32, -limf, limf),
        "fc_b": jax.random.uniform(ks[14], (NUM_CLASSES,), jnp.float32, -limf, limf),
    }

    out = c_block_forward(x, params, p1=P1, p2=P2)
    out = jax.block_until_ready(out)

    ref = c_block_ref(x, params, p1=P1, p2=P2)
    assert out.shape == (B, NUM_CLASSES)
    assert bool(jnp.allclose(jnp.sum(out, axis=1), 1.0, atol=1e-5)), "softmax rows must sum to 1"
    max_err = float(jnp.max(jnp.abs(out - ref)))
    assert bool(jnp.allclose(out, ref, atol=1e-4, rtol=1e-4)), f"mismatch vs reference: {max_err}"

    print("KERNEL_OK")
</pallas_src>

<mosaic_0001>
module attributes {stable_mosaic.version = 11 : i64} {
  func.func @c_block_kernel(%arg0: i32, %arg1: memref<2x80x4xf32, #tpu.memory_space<vmem>>, %arg2: memref<5x4x40xf32, #tpu.memory_space<vmem>>, %arg3: memref<1x40xf32, #tpu.memory_space<vmem>>, %arg4: memref<1x40xf32, #tpu.memory_space<vmem>>, %arg5: memref<5x40x20xf32, #tpu.memory_space<vmem>>, %arg6: memref<1x20xf32, #tpu.memory_space<vmem>>, %arg7: memref<1x20xf32, #tpu.memory_space<vmem>>, %arg8: memref<8x20x4xf32, #tpu.memory_space<vmem>>, %arg9: memref<1x4xf32, #tpu.memory_space<vmem>>, %arg10: memref<2x4xf32, #tpu.memory_space<vmem>>, %arg11: memref<2x84x4xf32, #tpu.memory_space<vmem>>, %arg12: memref<160x40xf32, #tpu.memory_space<vmem>>, %arg13: memref<2x20x40xf32, #tpu.memory_space<vmem>>, %arg14: memref<32x20xf32, #tpu.memory_space<vmem>>, %arg15: memref<16x20xf32, #tpu.memory_space<vmem>>) attributes {dimension_semantics = [#tpu.dimension_semantics<parallel>], iteration_bounds = array<i64: 1>, scalar_prefetch = 0 : i64, scratch_operands = 5 : i64, tpu.core_type = #tpu.core_type<tc>, window_params = [{transform_indices = @transform_0, window_bounds = array<i64: 2, 80, 4>}, {pipeline_mode = #tpu.pipeline_mode<synchronous>, transform_indices = @transform_1, window_bounds = array<i64: 5, 4, 40>}, {pipeline_mode = #tpu.pipeline_mode<synchronous>, transform_indices = @transform_2, window_bounds = array<i64: 1, 40>}, {pipeline_mode = #tpu.pipeline_mode<synchronous>, transform_indices = @transform_3, window_bounds = array<i64: 1, 40>}, {pipeline_mode = #tpu.pipeline_mode<synchronous>, transform_indices = @transform_4, window_bounds = array<i64: 5, 40, 20>}, {pipeline_mode = #tpu.pipeline_mode<synchronous>, transform_indices = @transform_5, window_bounds = array<i64: 1, 20>}, {pipeline_mode = #tpu.pipeline_mode<synchronous>, transform_indices = @transform_6, window_bounds = array<i64: 1, 20>}, {pipeline_mode = #tpu.pipeline_mode<synchronous>, transform_indices = @transform_7, window_bounds = array<i64: 8, 20, 4>}, {pipeline_mode = #tpu.pipeline_mode<synchronous>, transform_indices = @transform_8, window_bounds = array<i64: 1, 4>}, {transform_indices = @transform_9, window_bounds = array<i64: 2, 4>}]} {
    %cst = arith.constant 0.000000e+00 : f32
    %0 = vector.broadcast %cst : f32 to vector<2x2x4xf32>
    %c0 = arith.constant 0 : index
    %c0_0 = arith.constant 0 : index
    %c0_1 = arith.constant 0 : index
    %1 = vector.load %arg11[%c0, %c0_0, %c0_1] : memref<2x84x4xf32, #tpu.memory_space<vmem>>, vector<2x2x4xf32>
    tpu.vector_store %arg11[%c0, %c0_0, %c0_1], %0 {strides = array<i32>} : memref<2x84x4xf32, #tpu.memory_space<vmem>>, vector<2x2x4xf32>,
    %cst_2 = arith.constant 0.000000e+00 : f32
    %2 = vector.broadcast %cst_2 : f32 to vector<2x2x4xf32>
    %c0_3 = arith.constant 0 : index
    %c82 = arith.constant 82 : index
    %c0_4 = arith.constant 0 : index
    %3 = vector.load %arg11[%c0_3, %c82, %c0_4] : memref<2x84x4xf32, #tpu.memory_space<vmem>>, vector<2x2x4xf32>
    tpu.vector_store %arg11[%c0_3, %c82, %c0_4], %2 {strides = array<i32>} : memref<2x84x4xf32, #tpu.memory_space<vmem>>, vector<2x2x4xf32>,
    %c0_5 = arith.constant 0 : index
    %c0_6 = arith.constant 0 : index
    %c0_7 = arith.constant 0 : index
    %4 = vector.load %arg1[%c0_5, %c0_6, %c0_7] : memref<2x80x4xf32, #tpu.memory_space<vmem>>, vector<2x80x4xf32>
    %c0_8 = arith.constant 0 : index
    %c2 = arith.constant 2 : index
    %c0_9 = arith.constant 0 : index
    %5 = vector.load %arg11[%c0_8, %c2, %c0_9] : memref<2x84x4xf32, #tpu.memory_space<vmem>>, vector<2x80x4xf32>
    tpu.vector_store %arg11[%c0_8, %c2, %c0_9], %4 {strides = array<i32>} : memref<2x84x4xf32, #tpu.memory_space<vmem>>, vector<2x80x4xf32>,
    %c0_10 = arith.constant 0 : index
    %c0_11 = arith.constant 0 : index
    %c0_12 = arith.constant 0 : index
    %6 = vector.load %arg11[%c0_10, %c0_11, %c0_12] : memref<2x84x4xf32, #tpu.memory_space<vmem>>, vector<2x80x4xf32>
    %7 = vector.shape_cast %6 : vector<2x80x4xf32> to vector<160x4xf32>
    %c0_13 = arith.constant 0 : index
    %c0_14 = arith.constant 0 : index
    %c0_15 = arith.constant 0 : index
    %8 = vector.load %arg2[%c0_13, %c0_14, %c0_15] : memref<5x4x40xf32, #tpu.memory_space<vmem>>, vector<1x4x40xf32>
    %9 = vector.shape_cast %8 : vector<1x4x40xf32> to vector<4x40xf32>
    %cst_16 = arith.constant dense<0.000000e+00> : vector<160x40xf32>
    %10 = tpu.matmul %7, %9, %cst_16 {dimension_numbers = #tpu.dot_dimension_numbers<[1], [0], [0], [1], [0, 0, 1, 1], [], []>} : vector<160x4xf32>, vector<4x40xf32>, vector<160x40xf32> -> vector<160x40xf32>
    %c0_17 = arith.constant 0 : index
    %c1 = arith.constant 1 : index
    %c0_18 = arith.constant 0 : index
    %11 = vector.load %arg11[%c0_17, %c1, %c0_18] : memref<2x84x4xf32, #tpu.memory_space<vmem>>, vector<2x80x4xf32>
    %12 = vector.shape_cast %11 : vector<2x80x4xf32> to vector<160x4xf32>
    %c1_19 = arith.constant 1 : index
    %c0_20 = arith.constant 0 : index
    %c0_21 = arith.constant 0 : index
    %13 = vector.load %arg2[%c1_19, %c0_20, %c0_21] : memref<5x4x40xf32, #tpu.memory_space<vmem>>, vector<1x4x40xf32>
    %14 = vector.shape_cast %13 : vector<1x4x40xf32> to vector<4x40xf32>
    %cst_22 = arith.constant dense<0.000000e+00> : vector<160x40xf32>
    %15 = tpu.matmul %12, %14, %cst_22 {dimension_numbers = #tpu.dot_dimension_numbers<[1], [0], [0], [1], [0, 0, 1, 1], [], []>} : vector<160x4xf32>, vector<4x40xf32>, vector<160x40xf32> -> vector<160x40xf32>
    %16 = arith.addf %10, %15 : vector<160x40xf32>
    %c0_23 = arith.constant 0 : index
    %c2_24 = arith.constant 2 : index
    %c0_25 = arith.constant 0 : index
    %17 = vector.load %arg11[%c0_23, %c2_24, %c0_25] : memref<2x84x4xf32, #tpu.memory_space<vmem>>, vector<2x80x4xf32>
    %18 = vector.shape_cast %17 : vector<2x80x4xf32> to vector<160x4xf32>
    %c2_26 = arith.constant 2 : index
    %c0_27 = arith.constant 0 : index
    %c0_28 = arith.constant 0 : index
    %19 = vector.load %arg2[%c2_26, %c0_27, %c0_28] : memref<5x4x40xf32, #tpu.memory_space<vmem>>, vector<1x4x40xf32>
    %20 = vector.shape_cast %19 : vector<1x4x40xf32> to vector<4x40xf32>
    %cst_29 = arith.constant dense<0.000000e+00> : vector<160x40xf32>
    %21 = tpu.matmul %18, %20, %cst_29 {dimension_numbers = #tpu.dot_dimension_numbers<[1], [0], [0], [1], [0, 0, 1, 1], [], []>} : vector<160x4xf32>, vector<4x40xf32>, vector<160x40xf32> -> vector<160x40xf32>
    %22 = arith.addf %16, %21 : vector<160x40xf32>
    %c0_30 = arith.constant 0 : index
    %c3 = arith.constant 3 : index
    %c0_31 = arith.constant 0 : index
    %23 = vector.load %arg11[%c0_30, %c3, %c0_31] : memref<2x84x4xf32, #tpu.memory_space<vmem>>, vector<2x80x4xf32>
    %24 = vector.shape_cast %23 : vector<2x80x4xf32> to vector<160x4xf32>
    %c3_32 = arith.constant 3 : index
    %c0_33 = arith.constant 0 : index
    %c0_34 = arith.constant 0 : index
    %25 = vector.load %arg2[%c3_32, %c0_33, %c0_34] : memref<5x4x40xf32, #tpu.memory_space<vmem>>, vector<1x4x40xf32>
    %26 = vector.shape_cast %25 : vector<1x4x40xf32> to vector<4x40xf32>
    %cst_35 = arith.constant dense<0.000000e+00> : vector<160x40xf32>
    %27 = tpu.matmul %24, %26, %cst_35 {dimension_numbers = #tpu.dot_dimension_numbers<[1], [0], [0], [1], [0, 0, 1, 1], [], []>} : vector<160x4xf32>, vector<4x40xf32>, vector<160x40xf32> -> vector<160x40xf32>
    %28 = arith.addf %22, %27 : vector<160x40xf32>
    %c0_36 = arith.constant 0 : index
    %c4 = arith.constant 4 : index
    %c0_37 = arith.constant 0 : index
    %29 = vector.load %arg11[%c0_36, %c4, %c0_37] : memref<2x84x4xf32, #tpu.memory_space<vmem>>, vector<2x80x4xf32>
    %30 = vector.shape_cast %29 : vector<2x80x4xf32> to vector<160x4xf32>
    %c4_38 = arith.constant 4 : index
    %c0_39 = arith.constant 0 : index
    %c0_40 = arith.constant 0 : index
    %31 = vector.load %arg2[%c4_38, %c0_39, %c0_40] : memref<5x4x40xf32, #tpu.memory_space<vmem>>, vector<1x4x40xf32>
    %32 = vector.shape_cast %31 : vector<1x4x40xf32> to vector<4x40xf32>
    %cst_41 = arith.constant dense<0.000000e+00> : vector<160x40xf32>
    %33 = tpu.matmul %30, %32, %cst_41 {dimension_numbers = #tpu.dot_dimension_numbers<[1], [0], [0], [1], [0, 0, 1, 1], [], []>} : vector<160x4xf32>, vector<4x40xf32>, vector<160x40xf32> -> vector<160x40xf32>
    %34 = arith.addf %28, %33 : vector<160x40xf32>
    %c0_42 = arith.constant 0 : index
    %c0_43 = arith.constant 0 : index
    %35 = vector.load %arg12[%c0_42, %c0_43] : memref<160x40xf32, #tpu.memory_space<vmem>>, vector<160x40xf32>
    tpu.vector_store %arg12[%c0_42, %c0_43], %34 {strides = array<i32>} : memref<160x40xf32, #tpu.memory_space<vmem>>, vector<160x40xf32>,
    %c0_44 = arith.constant 0 : index
    %c0_45 = arith.constant 0 : index
    %36 = tpu.strided_load %arg12[%c0_44, %c0_45] {strides = array<i32: 5, 1>} : memref<160x40xf32, #tpu.memory_space<vmem>>, vector<32x40xf32>
    %c1_46 = arith.constant 1 : index
    %c0_47 = arith.constant 0 : index
    %37 = tpu.strided_load %arg12[%c1_46, %c0_47] {strides = array<i32: 5, 1>} : memref<160x40xf32, #tpu.memory_space<vmem>>, vector<32x40xf32>
    %38 = arith.maximumf %36, %37 : vector<32x40xf32>
    %c2_48 = arith.constant 2 : index
    %c0_49 = arith.constant 0 : index
    %39 = tpu.strided_load %arg12[%c2_48, %c0_49] {strides = array<i32: 5, 1>} : memref<160x40xf32, #tpu.memory_space<vmem>>, vector<32x40xf32>
    %40 = arith.maximumf %38, %39 : vector<32x40xf32>
    %c3_50 = arith.constant 3 : index
    %c0_51 = arith.constant 0 : index
    %41 = tpu.strided_load %arg12[%c3_50, %c0_51] {strides = array<i32: 5, 1>} : memref<160x40xf32, #tpu.memory_space<vmem>>, vector<32x40xf32>
    %42 = arith.maximumf %40, %41 : vector<32x40xf32>
    %c4_52 = arith.constant 4 : index
    %c0_53 = arith.constant 0 : index
    %43 = tpu.strided_load %arg12[%c4_52, %c0_53] {strides = array<i32: 5, 1>} : memref<160x40xf32, #tpu.memory_space<vmem>>, vector<32x40xf32>
    %44 = arith.maximumf %42, %43 : vector<32x40xf32>
    %c0_54 = arith.constant 0 : index
    %c0_55 = arith.constant 0 : index
    %45 = vector.load %arg3[%c0_54, %c0_55] : memref<1x40xf32, #tpu.memory_space<vmem>>, vector<1x40xf32>
    %46 = vector.broadcast %45 : vector<1x40xf32> to vector<32x40xf32>
    %47 = arith.mulf %44, %46 : vector<32x40xf32>
    %c0_56 = arith.constant 0 : index
    %c0_57 = arith.constant 0 : index
    %48 = vector.load %arg4[%c0_56, %c0_57] : memref<1x40xf32, #tpu.memory_space<vmem>>, vector<1x40xf32>
    %49 = vector.broadcast %48 : vector<1x40xf32> to vector<32x40xf32>
    %50 = arith.addf %47, %49 : vector<32x40xf32>
    %cst_58 = arith.constant 0.000000e+00 : f32
    %51 = vector.broadcast %cst_58 : f32 to vector<32x40xf32>
    %52 = arith.cmpf ogt, %50, %51 : vector<32x40xf32>
    %53 = math.exp %50 : vector<32x40xf32>
    %cst_59 = arith.constant 1.000000e+00 : f32
    %54 = vector.broadcast %cst_59 : f32 to vector<32x40xf32>
    %55 = arith.subf %53, %54 : vector<32x40xf32>
    %56 = arith.select %52, %50, %55 : vector<32x40xi1>, vector<32x40xf32>
    %cst_60 = arith.constant 0.000000e+00 : f32
    %57 = vector.broadcast %cst_60 : f32 to vector<2x2x40xf32>
    %c0_61 = arith.constant 0 : index
    %c0_62 = arith.constant 0 : index
    %c0_63 = arith.constant 0 : index
    %58 = vector.load %arg13[%c0_61, %c0_62, %c0_63] : memref<2x20x40xf32, #tpu.memory_space<vmem>>, vector<2x2x40xf32>
    tpu.vector_store %arg13[%c0_61, %c0_62, %c0_63], %57 {strides = array<i32>} : memref<2x20x40xf32, #tpu.memory_space<vmem>>, vector<2x2x40xf32>,
    %cst_64 = arith.constant 0.000000e+00 : f32
    %59 = vector.broadcast %cst_64 : f32 to vector<2x2x40xf32>
    %c0_65 = arith.constant 0 : index
    %c18 = arith.constant 18 : index
    %c0_66 = arith.constant 0 : index
    %60 = vector.load %arg13[%c0_65, %c18, %c0_66] : memref<2x20x40xf32, #tpu.memory_space<vmem>>, vector<2x2x40xf32>
    tpu.vector_store %arg13[%c0_65, %c18, %c0_66], %59 {strides = array<i32>} : memref<2x20x40xf32, #tpu.memory_space<vmem>>, vector<2x2x40xf32>,
    %61 = vector.shape_cast %56 : vector<32x40xf32> to vector<2x16x40xf32>
    %c0_67 = arith.constant 0 : index
    %c2_68 = arith.constant 2 : index
    %c0_69 = arith.constant 0 : index
    %62 = vector.load %arg13[%c0_67, %c2_68, %c0_69] : memref<2x20x40xf32, #tpu.memory_space<vmem>>, vector<2x16x40xf32>
    tpu.vector_store %arg13[%c0_67, %c2_68, %c0_69], %61 {strides = array<i32>} : memref<2x20x40xf32, #tpu.memory_space<vmem>>, vector<2x16x40xf32>,
    %c0_70 = arith.constant 0 : index
    %c0_71 = arith.constant 0 : index
    %c0_72 = arith.constant 0 : index
    %63 = vector.load %arg13[%c0_70, %c0_71, %c0_72] : memref<2x20x40xf32, #tpu.memory_space<vmem>>, vector<2x16x40xf32>
    %64 = vector.shape_cast %63 : vector<2x16x40xf32> to vector<32x40xf32>
    %c0_73 = arith.constant 0 : index
    %c0_74 = arith.constant 0 : index
    %c0_75 = arith.constant 0 : index
    %65 = vector.load %arg5[%c0_73, %c0_74, %c0_75] : memref<5x40x20xf32, #tpu.memory_space<vmem>>, vector<1x40x20xf32>
    %66 = vector.shape_cast %65 : vector<1x40x20xf32> to vector<40x20xf32>
    %cst_76 = arith.constant dense<0.000000e+00> : vector<32x20xf32>
    %67 = tpu.matmul %64, %66, %cst_76 {dimension_numbers = #tpu.dot_dimension_numbers<[1], [0], [0], [1], [0, 0, 1, 1], [], []>} : vector<32x40xf32>, vector<40x20xf32>, vector<32x20xf32> -> vector<32x20xf32>
    %c0_77 = arith.constant 0 : index
    %c1_78 = arith.constant 1 : index
    %c0_79 = arith.constant 0 : index
    %68 = vector.load %arg13[%c0_77, %c1_78, %c0_79] : memref<2x20x40xf32, #tpu.memory_space<vmem>>, vector<2x16x40xf32>
    %69 = vector.shape_cast %68 : vector<2x16x40xf32> to vector<32x40xf32>
    %c1_80 = arith.constant 1 : index
    %c0_81 = arith.constant 0 : index
    %c0_82 = arith.constant 0 : index
    %70 = vector.load %arg5[%c1_80, %c0_81, %c0_82] : memref<5x40x20xf32, #tpu.memory_space<vmem>>, vector<1x40x20xf32>
    %71 = vector.shape_cast %70 : vector<1x40x20xf32> to vector<40x20xf32>
    %cst_83 = arith.constant dense<0.000000e+00> : vector<32x20xf32>
    %72 = tpu.matmul %69, %71, %cst_83 {dimension_numbers = #tpu.dot_dimension_numbers<[1], [0], [0], [1], [0, 0, 1, 1], [], []>} : vector<32x40xf32>, vector<40x20xf32>, vector<32x20xf32> -> vector<32x20xf32>
    %73 = arith.addf %67, %72 : vector<32x20xf32>
    %c0_84 = arith.constant 0 : index
    %c2_85 = arith.constant 2 : index
    %c0_86 = arith.constant 0 : index
    %74 = vector.load %arg13[%c0_84, %c2_85, %c0_86] : memref<2x20x40xf32, #tpu.memory_space<vmem>>, vector<2x16x40xf32>
    %75 = vector.shape_cast %74 : vector<2x16x40xf32> to vector<32x40xf32>
    %c2_87 = arith.constant 2 : index
    %c0_88 = arith.constant 0 : index
    %c0_89 = arith.constant 0 : index
    %76 = vector.load %arg5[%c2_87, %c0_88, %c0_89] : memref<5x40x20xf32, #tpu.memory_space<vmem>>, vector<1x40x20xf32>
    %77 = vector.shape_cast %76 : vector<1x40x20xf32> to vector<40x20xf32>
    %cst_90 = arith.constant dense<0.000000e+00> : vector<32x20xf32>
    %78 = tpu.matmul %75, %77, %cst_90 {dimension_numbers = #tpu.dot_dimension_numbers<[1], [0], [0], [1], [0, 0, 1, 1], [], []>} : vector<32x40xf32>, vector<40x20xf32>, vector<32x20xf32> -> vector<32x20xf32>
    %79 = arith.addf %73, %78 : vector<32x20xf32>
    %c0_91 = arith.constant 0 : index
    %c3_92 = arith.constant 3 : index
    %c0_93 = arith.constant 0 : index
    %80 = vector.load %arg13[%c0_91, %c3_92, %c0_93] : memref<2x20x40xf32, #tpu.memory_space<vmem>>, vector<2x16x40xf32>
    %81 = vector.shape_cast %80 : vector<2x16x40xf32> to vector<32x40xf32>
    %c3_94 = arith.constant 3 : index
    %c0_95 = arith.constant 0 : index
    %c0_96 = arith.constant 0 : index
    %82 = vector.load %arg5[%c3_94, %c0_95, %c0_96] : memref<5x40x20xf32, #tpu.memory_space<vmem>>, vector<1x40x20xf32>
    %83 = vector.shape_cast %82 : vector<1x40x20xf32> to vector<40x20xf32>
    %cst_97 = arith.constant dense<0.000000e+00> : vector<32x20xf32>
    %84 = tpu.matmul %81, %83, %cst_97 {dimension_numbers = #tpu.dot_dimension_numbers<[1], [0], [0], [1], [0, 0, 1, 1], [], []>} : vector<32x40xf32>, vector<40x20xf32>, vector<32x20xf32> -> vector<32x20xf32>
    %85 = arith.addf %79, %84 : vector<32x20xf32>
    %c0_98 = arith.constant 0 : index
    %c4_99 = arith.constant 4 : index
    %c0_100 = arith.constant 0 : index
    %86 = vector.load %arg13[%c0_98, %c4_99, %c0_100] : memref<2x20x40xf32, #tpu.memory_space<vmem>>, vector<2x16x40xf32>
    %87 = vector.shape_cast %86 : vector<2x16x40xf32> to vector<32x40xf32>
    %c4_101 = arith.constant 4 : index
    %c0_102 = arith.constant 0 : index
    %c0_103 = arith.constant 0 : index
    %88 = vector.load %arg5[%c4_101, %c0_102, %c0_103] : memref<5x40x20xf32, #tpu.memory_space<vmem>>, vector<1x40x20xf32>
    %89 = vector.shape_cast %88 : vector<1x40x20xf32> to vector<40x20xf32>
    %cst_104 = arith.constant dense<0.000000e+00> : vector<32x20xf32>
    %90 = tpu.matmul %87, %89, %cst_104 {dimension_numbers = #tpu.dot_dimension_numbers<[1], [0], [0], [1], [0, 0, 1, 1], [], []>} : vector<32x40xf32>, vector<40x20xf32>, vector<32x20xf32> -> vector<32x20xf32>
    %91 = arith.addf %85, %90 : vector<32x20xf32>
    %c0_105 = arith.constant 0 : index
    %c0_106 = arith.constant 0 : index
    %92 = vector.load %arg14[%c0_105, %c0_106] : memref<32x20xf32, #tpu.memory_space<vmem>>, vector<32x20xf32>
    tpu.vector_store %arg14[%c0_105, %c0_106], %91 {strides = array<i32>} : memref<32x20xf32, #tpu.memory_space<vmem>>, vector<32x20xf32>,
    %c0_107 = arith.constant 0 : index
    %c0_108 = arith.constant 0 : index
    %93 = tpu.strided_load %arg14[%c0_107, %c0_108] {strides = array<i32: 2, 1>} : memref<32x20xf32, #tpu.memory_space<vmem>>, vector<16x20xf32>
    %c1_109 = arith.constant 1 : index
    %c0_110 = arith.constant 0 : index
    %94 = tpu.strided_load %arg14[%c1_109, %c0_110] {strides = array<i32: 2, 1>} : memref<32x20xf32, #tpu.memory_space<vmem>>, vector<16x20xf32>
    %95 = arith.maximumf %93, %94 : vector<16x20xf32>
    %c0_111 = arith.constant 0 : index
    %c0_112 = arith.constant 0 : index
    %96 = vector.load %arg6[%c0_111, %c0_112] : memref<1x20xf32, #tpu.memory_space<vmem>>, vector<1x20xf32>
    %97 = vector.broadcast %96 : vector<1x20xf32> to vector<16x20xf32>
    %98 = arith.mulf %95, %97 : vector<16x20xf32>
    %c0_113 = arith.constant 0 : index
    %c0_114 = arith.constant 0 : index
    %99 = vector.load %arg7[%c0_113, %c0_114] : memref<1x20xf32, #tpu.memory_space<vmem>>, vector<1x20xf32>
    %100 = vector.broadcast %99 : vector<1x20xf32> to vector<16x20xf32>
    %101 = arith.addf %98, %100 : vector<16x20xf32>
    %cst_115 = arith.constant 0.000000e+00 : f32
    %102 = vector.broadcast %cst_115 : f32 to vector<16x20xf32>
    %103 = arith.cmpf ogt, %101, %102 : vector<16x20xf32>
    %104 = math.exp %101 : vector<16x20xf32>
    %cst_116 = arith.constant 1.000000e+00 : f32
    %105 = vector.broadcast %cst_116 : f32 to vector<16x20xf32>
    %106 = arith.subf %104, %105 : vector<16x20xf32>
    %107 = arith.select %103, %101, %106 : vector<16x20xi1>, vector<16x20xf32>
    %c0_117 = arith.constant 0 : index
    %c0_118 = arith.constant 0 : index
    %108 = vector.load %arg15[%c0_117, %c0_118] : memref<16x20xf32, #tpu.memory_space<vmem>>, vector<16x20xf32>
    tpu.vector_store %arg15[%c0_117, %c0_118], %107 {strides = array<i32>} : memref<16x20xf32, #tpu.memory_space<vmem>>, vector<16x20xf32>,
    %c0_119 = arith.constant 0 : index
    %c0_120 = arith.constant 0 : index
    %109 = tpu.strided_load %arg15[%c0_119, %c0_120] {strides = array<i32: 8, 1>} : memref<16x20xf32, #tpu.memory_space<vmem>>, vector<2x20xf32>
    %c0_121 = arith.constant 0 : index
    %c0_122 = arith.constant 0 : index
    %c0_123 = arith.constant 0 : index
    %110 = vector.load %arg8[%c0_121, %c0_122, %c0_123] : memref<8x20x4xf32, #tpu.memory_space<vmem>>, vector<1x20x4xf32>
    %111 = vector.shape_cast %110 : vector<1x20x4xf32> to vector<20x4xf32>
    %cst_124 = arith.constant dense<0.000000e+00> : vector<2x4xf32>
    %112 = tpu.matmul %109, %111, %cst_124 {dimension_numbers = #tpu.dot_dimension_numbers<[1], [0], [0], [1], [0, 0, 1, 1], [], []>} : vector<2x20xf32>, vector<20x4xf32>, vector<2x4xf32> -> vector<2x4xf32>
    %c1_125 = arith.constant 1 : index
    %c0_126 = arith.constant 0 : index
    %113 = tpu.strided_load %arg15[%c1_125, %c0_126] {strides = array<i32: 8, 1>} : memref<16x20xf32, #tpu.memory_space<vmem>>, vector<2x20xf32>
    %c1_127 = arith.constant 1 : index
    %c0_128 = arith.constant 0 : index
    %c0_129 = arith.constant 0 : index
    %114 = vector.load %arg8[%c1_127, %c0_128, %c0_129] : memref<8x20x4xf32, #tpu.memory_space<vmem>>, vector<1x20x4xf32>
    %115 = vector.shape_cast %114 : vector<1x20x4xf32> to vector<20x4xf32>
    %cst_130 = arith.constant dense<0.000000e+00> : vector<2x4xf32>
    %116 = tpu.matmul %113, %115, %cst_130 {dimension_numbers = #tpu.dot_dimension_numbers<[1], [0], [0], [1], [0, 0, 1, 1], [], []>} : vector<2x20xf32>, vector<20x4xf32>, vector<2x4xf32> -> vector<2x4xf32>
    %117 = arith.addf %112, %116 : vector<2x4xf32>
    %c2_131 = arith.constant 2 : index
    %c0_132 = arith.constant 0 : index
    %118 = tpu.strided_load %arg15[%c2_131, %c0_132] {strides = array<i32: 8, 1>} : memref<16x20xf32, #tpu.memory_space<vmem>>, vector<2x20xf32>
    %c2_133 = arith.constant 2 : index
    %c0_134 = arith.constant 0 : index
    %c0_135 = arith.constant 0 : index
    %119 = vector.load %arg8[%c2_133, %c0_134, %c0_135] : memref<8x20x4xf32, #tpu.memory_space<vmem>>, vector<1x20x4xf32>
    %120 = vector.shape_cast %119 : vector<1x20x4xf32> to vector<20x4xf32>
    %cst_136 = arith.constant dense<0.000000e+00> : vector<2x4xf32>
    %121 = tpu.matmul %118, %120, %cst_136 {dimension_numbers = #tpu.dot_dimension_numbers<[1], [0], [0], [1], [0, 0, 1, 1], [], []>} : vector<2x20xf32>, vector<20x4xf32>, vector<2x4xf32> -> vector<2x4xf32>
    %122 = arith.addf %117, %121 : vector<2x4xf32>
    %c3_137 = arith.constant 3 : index
    %c0_138 = arith.constant 0 : index
    %123 = tpu.strided_load %arg15[%c3_137, %c0_138] {strides = array<i32: 8, 1>} : memref<16x20xf32, #tpu.memory_space<vmem>>, vector<2x20xf32>
    %c3_139 = arith.constant 3 : index
    %c0_140 = arith.constant 0 : index
    %c0_141 = arith.constant 0 : index
    %124 = vector.load %arg8[%c3_139, %c0_140, %c0_141] : memref<8x20x4xf32, #tpu.memory_space<vmem>>, vector<1x20x4xf32>
    %125 = vector.shape_cast %124 : vector<1x20x4xf32> to vector<20x4xf32>
    %cst_142 = arith.constant dense<0.000000e+00> : vector<2x4xf32>
    %126 = tpu.matmul %123, %125, %cst_142 {dimension_numbers = #tpu.dot_dimension_numbers<[1], [0], [0], [1], [0, 0, 1, 1], [], []>} : vector<2x20xf32>, vector<20x4xf32>, vector<2x4xf32> -> vector<2x4xf32>
    %127 = arith.addf %122, %126 : vector<2x4xf32>
    %c4_143 = arith.constant 4 : index
    %c0_144 = arith.constant 0 : index
    %128 = tpu.strided_load %arg15[%c4_143, %c0_144] {strides = array<i32: 8, 1>} : memref<16x20xf32, #tpu.memory_space<vmem>>, vector<2x20xf32>
    %c4_145 = arith.constant 4 : index
    %c0_146 = arith.constant 0 : index
    %c0_147 = arith.constant 0 : index
    %129 = vector.load %arg8[%c4_145, %c0_146, %c0_147] : memref<8x20x4xf32, #tpu.memory_space<vmem>>, vector<1x20x4xf32>
    %130 = vector.shape_cast %129 : vector<1x20x4xf32> to vector<20x4xf32>
    %cst_148 = arith.constant dense<0.000000e+00> : vector<2x4xf32>
    %131 = tpu.matmul %128, %130, %cst_148 {dimension_numbers = #tpu.dot_dimension_numbers<[1], [0], [0], [1], [0, 0, 1, 1], [], []>} : vector<2x20xf32>, vector<20x4xf32>, vector<2x4xf32> -> vector<2x4xf32>
    %132 = arith.addf %127, %131 : vector<2x4xf32>
    %c5 = arith.constant 5 : index
    %c0_149 = arith.constant 0 : index
    %133 = tpu.strided_load %arg15[%c5, %c0_149] {strides = array<i32: 8, 1>} : memref<16x20xf32, #tpu.memory_space<vmem>>, vector<2x20xf32>
    %c5_150 = arith.constant 5 : index
    %c0_151 = arith.constant 0 : index
    %c0_152 = arith.constant 0 : index
    %134 = vector.load %arg8[%c5_150, %c0_151, %c0_152] : memref<8x20x4xf32, #tpu.memory_space<vmem>>, vector<1x20x4xf32>
    %135 = vector.shape_cast %134 : vector<1x20x4xf32> to vector<20x4xf32>
    %cst_153 = arith.constant dense<0.000000e+00> : vector<2x4xf32>
    %136 = tpu.matmul %133, %135, %cst_153 {dimension_numbers = #tpu.dot_dimension_numbers<[1], [0], [0], [1], [0, 0, 1, 1], [], []>} : vector<2x20xf32>, vector<20x4xf32>, vector<2x4xf32> -> vector<2x4xf32>
    %137 = arith.addf %132, %136 : vector<2x4xf32>
    %c6 = arith.constant 6 : index
    %c0_154 = arith.constant 0 : index
    %138 = tpu.strided_load %arg15[%c6, %c0_154] {strides = array<i32: 8, 1>} : memref<16x20xf32, #tpu.memory_space<vmem>>, vector<2x20xf32>
    %c6_155 = arith.constant 6 : index
    %c0_156 = arith.constant 0 : index
    %c0_157 = arith.constant 0 : index
    %139 = vector.load %arg8[%c6_155, %c0_156, %c0_157] : memref<8x20x4xf32, #tpu.memory_space<vmem>>, vector<1x20x4xf32>
    %140 = vector.shape_cast %139 : vector<1x20x4xf32> to vector<20x4xf32>
    %cst_158 = arith.constant dense<0.000000e+00> : vector<2x4xf32>
    %141 = tpu.matmul %138, %140, %cst_158 {dimension_numbers = #tpu.dot_dimension_numbers<[1], [0], [0], [1], [0, 0, 1, 1], [], []>} : vector<2x20xf32>, vector<20x4xf32>, vector<2x4xf32> -> vector<2x4xf32>
    %142 = arith.addf %137, %141 : vector<2x4xf32>
    %c7 = arith.constant 7 : index
    %c0_159 = arith.constant 0 : index
    %143 = tpu.strided_load %arg15[%c7, %c0_159] {strides = array<i32: 8, 1>} : memref<16x20xf32, #tpu.memory_space<vmem>>, vector<2x20xf32>
    %c7_160 = arith.constant 7 : index
    %c0_161 = arith.constant 0 : index
    %c0_162 = arith.constant 0 : index
    %144 = vector.load %arg8[%c7_160, %c0_161, %c0_162] : memref<8x20x4xf32, #tpu.memory_space<vmem>>, vector<1x20x4xf32>
    %145 = vector.shape_cast %144 : vector<1x20x4xf32> to vector<20x4xf32>
    %cst_163 = arith.constant dense<0.000000e+00> : vector<2x4xf32>
    %146 = tpu.matmul %143, %145, %cst_163 {dimension_numbers = #tpu.dot_dimension_numbers<[1], [0], [0], [1], [0, 0, 1, 1], [], []>} : vector<2x20xf32>, vector<20x4xf32>, vector<2x4xf32> -> vector<2x4xf32>
    %147 = arith.addf %142, %146 : vector<2x4xf32>
    %c0_164 = arith.constant 0 : index
    %c0_165 = arith.constant 0 : index
    %148 = vector.load %arg9[%c0_164, %c0_165] : memref<1x4xf32, #tpu.memory_space<vmem>>, vector<1x4xf32>
    %149 = vector.broadcast %148 : vector<1x4xf32> to vector<2x4xf32>
    %150 = arith.addf %147, %149 : vector<2x4xf32>
    %cst_166 = arith.constant dense<0xFF800000> : vector<2xf32>
    %151 = vector.multi_reduction <maximumf>, %150, %cst_166 [1] : vector<2x4xf32> to vector<2xf32>
    %152 = vector.shape_cast %151 : vector<2xf32> to vector<2x1xf32>
    %153 = vector.broadcast %152 : vector<2x1xf32> to vector<2x4xf32>
    %154 = arith.subf %150, %153 : vector<2x4xf32>
    %155 = math.exp %154 : vector<2x4xf32>
    %cst_167 = arith.constant dense<0.000000e+00> : vector<2xf32>
    %156 = vector.multi_reduction <add>, %155, %cst_167 [1] : vector<2x4xf32> to vector<2xf32>
    %157 = vector.shape_cast %156 : vector<2xf32> to vector<2x1xf32>
    %158 = vector.broadcast %157 : vector<2x1xf32> to vector<2x4xf32>
    %159 = arith.divf %155, %158 : vector<2x4xf32>
    %c0_168 = arith.constant 0 : index
    %c0_169 = arith.constant 0 : index
    %160 = vector.load %arg10[%c0_168, %c0_169] : memref<2x4xf32, #tpu.memory_space<vmem>>, vector<2x4xf32>
    tpu.vector_store %arg10[%c0_168, %c0_169], %159 {strides = array<i32>} : memref<2x4xf32, #tpu.memory_space<vmem>>, vector<2x4xf32>,
    return
  }
  func.func @transform_0(%arg0: i32) -> (i32, i32, i32) {
    %c0_i32 = arith.constant 0 : i32
    %c0_i32_0 = arith.constant 0 : i32
    %c0_i32_1 = arith.constant 0 : i32
    return %arg0, %c0_i32, %c0_i32_0 : i32, i32, i32
  }
  func.func @transform_1(%arg0: i32) -> (i32, i32, i32) {
    %c0_i32 = arith.constant 0 : i32
    %c0_i32_0 = arith.constant 0 : i32
    %c0_i32_1 = arith.constant 0 : i32
    %c0_i32_2 = arith.constant 0 : i32
    return %c0_i32, %c0_i32_0, %c0_i32_1 : i32, i32, i32
  }
  func.func @transform_2(%arg0: i32) -> (i32, i32) {
    %c0_i32 = arith.constant 0 : i32
    %c0_i32_0 = arith.constant 0 : i32
    %c0_i32_1 = arith.constant 0 : i32
    return %c0_i32, %c0_i32_0 : i32, i32
  }
  func.func @transform_3(%arg0: i32) -> (i32, i32) {
    %c0_i32 = arith.constant 0 : i32
    %c0_i32_0 = arith.constant 0 : i32
    %c0_i32_1 = arith.constant 0 : i32
    return %c0_i32, %c0_i32_0 : i32, i32
  }
  func.func @transform_4(%arg0: i32) -> (i32, i32, i32) {
    %c0_i32 = arith.constant 0 : i32
    %c0_i32_0 = arith.constant 0 : i32
    %c0_i32_1 = arith.constant 0 : i32
    %c0_i32_2 = arith.constant 0 : i32
    return %c0_i32, %c0_i32_0, %c0_i32_1 : i32, i32, i32
  }
  func.func @transform_5(%arg0: i32) -> (i32, i32) {
    %c0_i32 = arith.constant 0 : i32
    %c0_i32_0 = arith.constant 0 : i32
    %c0_i32_1 = arith.constant 0 : i32
    return %c0_i32, %c0_i32_0 : i32, i32
  }
  func.func @transform_6(%arg0: i32) -> (i32, i32) {
    %c0_i32 = arith.constant 0 : i32
    %c0_i32_0 = arith.constant 0 : i32
    %c0_i32_1 = arith.constant 0 : i32
    return %c0_i32, %c0_i32_0 : i32, i32
  }
  func.func @transform_7(%arg0: i32) -> (i32, i32, i32) {
    %c0_i32 = arith.constant 0 : i32
    %c0_i32_0 = arith.constant 0 : i32
    %c0_i32_1 = arith.constant 0 : i32
    %c0_i32_2 = arith.constant 0 : i32
    return %c0_i32, %c0_i32_0, %c0_i32_1 : i32, i32, i32
  }
  func.func @transform_8(%arg0: i32) -> (i32, i32) {
    %c0_i32 = arith.constant 0 : i32
    %c0_i32_0 = arith.constant 0 : i32
    %c0_i32_1 = arith.constant 0 : i32
    return %c0_i32, %c0_i32_0 : i32, i32
  }
  func.func @transform_9(%arg0: i32) -> (i32, i32) {
    %c0_i32 = arith.constant 0 : i32
    %c0_i32_0 = arith.constant 0 : i32
    return %arg0, %c0_i32 : i32, i32
  }
}

</mosaic_0001>

<bundles_post_ra>
// kernel: tpu_custom_call.1
= control target key start
LH: loop header
LB: loop body
LE: loop exit
PB: predicated region body
PF: predicated region fallthrough
CT: control target
= control target key end

     0   :  { %vm182_vm0 = vcmask 1043456   ;;  %vm33_vm1 = vcmask 25600   ;;  %v3697_v2 = vmov 0.0   ;;  %vm58_vm2 = vcmask 31744   ;;  %s4295_s0 = inlined_call_operand.vmem [shape: f32[2,80,4], index: 0, kind: input, shape index: {}]   ;;  %s4296_s1 = inlined_call_operand.vmem [shape: f32[5,4,40], index: 1, kind: input, shape index: {}]   ;;  %s4297_s2 = inlined_call_operand.vmem [shape: f32[1,40], index: 2, kind: input, shape index: {}]   ;;  %s4298_s3 = inlined_call_operand.vmem [shape: f32[1,40], index: 3, kind: input, shape index: {}]   ;;  %s4299_s4 = inlined_call_operand.vmem [shape: f32[5,40,20], index: 4, kind: input, shape index: {}]   ;;  %s4300_s5 = inlined_call_operand.vmem [shape: f32[1,20], index: 5, kind: input, shape index: {}]   ;;  %s4301_s6 = inlined_call_operand.vmem [shape: f32[1,20], index: 6, kind: input, shape index: {}]   ;;  %s4302_s7 = inlined_call_operand.vmem [shape: f32[8,20,4], index: 7, kind: input, shape index: {}]   ;;  %s4303_s8 = inlined_call_operand.vmem [shape: f32[1,4], index: 8, kind: input, shape index: {}]   ;;  %s4304_s9 = inlined_call_operand.hbm [shape: f32[2,4], index: 9, kind: output, shape index: {}]  }
   0x1   :  { %v3754_v0 = vld [vmem:[%s4296_s1] sm:$0xf]  ;;  %34 = vst.msk [vmem:[#allocation2] sm:$0x3] %vm33_vm1, %v3697_v2  ;;  %35 = vst.msk [vmem:[#allocation2 + $0x58] sm:$0x3] %vm33_vm1, %v3697_v2 }
   0x2   :  { %v38_v1 = vld [vmem:[%s4295_s0] sm:$0xff]  ;;  %3211 = vmatprep.subr.msk.mxu0 %vm182_vm0, %v3754_v0  ;;  %36 = vst.msk [vmem:[#allocation2 + $0x52] sm:$0x3] %vm33_vm1, %v3697_v2  ;;  %37 = vst.msk [vmem:[#allocation2 + $0xaa] sm:$0x3] %vm33_vm1, %v3697_v2  ;;  %v39_v3 = vld [vmem:[%s4295_s0 + $0x8] sm:$0xff] }
   0x3   :  { %v2843_v4 = vld [vmem:[%s4296_s1 + $0x8] sm:$0xf]  ;;  %v40_v5 = vld [vmem:[%s4295_s0 + $0x10] sm:$0xff]  ;;  %3212 = vmatpush3.msk.msra.mxu0 %vm182_vm0, %v3754_v0  ;;  %59 = vst.msk [vmem:[#allocation2 + $0x2] sm:$0xff] %vm58_vm2, %v38_v1  ;;  %60 = vst.msk [vmem:[#allocation2 + $0xa] sm:$0xff] %vm58_vm2, %v39_v3 }
   0x4   :  { %61 = vst.msk [vmem:[#allocation2 + $0x12] sm:$0xff] %vm58_vm2, %v40_v5  ;;  %v41_v6 = vld [vmem:[%s4295_s0 + $0x18] sm:$0xff]  ;;  %v42_v7 = vld [vmem:[%s4295_s0 + $0x20] sm:$0xff]  ;;  %v43_v8 = vld [vmem:[%s4295_s0 + $0x28] sm:$0xff]  ;;  %3243 = vmatprep.subr.msk.mxu0 %vm182_vm0, %v2843_v4 }
   0x5   :  { %62 = vst.msk [vmem:[#allocation2 + $0x1a] sm:$0xff] %vm58_vm2, %v41_v6  ;;  %63 = vst.msk [vmem:[#allocation2 + $0x22] sm:$0xff] %vm58_vm2, %v42_v7  ;;  %v44_v9 = vld [vmem:[%s4295_s0 + $0x30] sm:$0xff]  ;;  %v45_v10 = vld [vmem:[%s4295_s0 + $0x38] sm:$0xff] }
   0x6   :  { %64 = vst.msk [vmem:[#allocation2 + $0x2a] sm:$0xff] %vm58_vm2, %v43_v8  ;;  %v46_v11 = vld [vmem:[%s4295_s0 + $0x40] sm:$0xff]  ;;  %65 = vst.msk [vmem:[#allocation2 + $0x32] sm:$0xff] %vm58_vm2, %v44_v9  ;;  %v47_v12 = vld [vmem:[%s4295_s0 + $0x48] sm:$0xff] }
   0x7   :  { %66 = vst.msk [vmem:[#allocation2 + $0x3a] sm:$0xff] %vm58_vm2, %v45_v10  ;;  %67 = vst.msk [vmem:[#allocation2 + $0x42] sm:$0xff] %vm58_vm2, %v46_v11  ;;  %v48_v13 = vld [vmem:[%s4295_s0 + $0x50] sm:$0xff]  ;;  %v49_v14 = vld [vmem:[%s4295_s0 + $0x58] sm:$0xff] }
   0x8   :  { %68 = vst.msk [vmem:[#allocation2 + $0x4a] sm:$0xff] %vm58_vm2, %v47_v12  ;;  %69 = vst.msk [vmem:[#allocation2 + $0x5a] sm:$0xff] %vm58_vm2, %v48_v13  ;;  %v50_v15 = vld [vmem:[%s4295_s0 + $0x60] sm:$0xff]  ;;  %v51_v16 = vld [vmem:[%s4295_s0 + $0x68] sm:$0xff] }
   0x9   :  { %70 = vst.msk [vmem:[#allocation2 + $0x62] sm:$0xff] %vm58_vm2, %v49_v14  ;;  %71 = vst.msk [vmem:[#allocation2 + $0x6a] sm:$0xff] %vm58_vm2, %v50_v15  ;;  %v52_v17 = vld [vmem:[%s4295_s0 + $0x70] sm:$0xff]  ;;  %v53_v18 = vld [vmem:[%s4295_s0 + $0x78] sm:$0xff] }
   0xa   :  { %72 = vst.msk [vmem:[#allocation2 + $0x72] sm:$0xff] %vm58_vm2, %v51_v16  ;;  %v54_v19 = vld [vmem:[%s4295_s0 + $0x80] sm:$0xff]  ;;  %73 = vst.msk [vmem:[#allocation2 + $0x7a] sm:$0xff] %vm58_vm2, %v52_v17  ;;  %v55_v20 = vld [vmem:[%s4295_s0 + $0x88] sm:$0xff] }
   0xb   :  { %74 = vst.msk [vmem:[#allocation2 + $0x82] sm:$0xff] %vm58_vm2, %v53_v18  ;;  %75 = vst.msk [vmem:[#allocation2 + $0x8a] sm:$0xff] %vm58_vm2, %v54_v19  ;;  %v56_v21 = vld [vmem:[%s4295_s0 + $0x90] sm:$0xff]  ;;  %v57_v22 = vld [vmem:[%s4295_s0 + $0x98] sm:$0xff] }
   0xc   :  { %76 = vst.msk [vmem:[#allocation2 + $0x92] sm:$0xff] %vm58_vm2, %v55_v20  ;;  %77 = vst.msk [vmem:[#allocation2 + $0x9a] sm:$0xff] %vm58_vm2, %v56_v21  ;;  %v2800_v23 = vld [vmem:[%s4296_s1 + $0x4] sm:$0xf] }
   0xd   :  { %78 = vst.msk [vmem:[#allocation2 + $0xa2] sm:$0xff] %vm58_vm2, %v57_v22 }
   0xe   :  { %14 = vsyncpa [#allocation8], 0  ;;  %v79_v24 = vld [vmem:[#allocation2] sm:$0xff]  ;;  %v80_v25 = vld [vmem:[#allocation2 + $0x8] sm:$0xff]  ;;  %3179 = vmatprep.subr.msk.mxu1 %vm182_vm0, %v2800_v23  ;;  %vm1507_vm3 = vcmask 320512   ;;  %vm1389_vm4 = vcmask 326656  }
   0xf   :  { %v81_v26 = vld [vmem:[#allocation2 + $0x10] sm:$0xff]  ;;  %3213 = vmatprep.mubr.msk.f32.mxu0 %vm58_vm2, %v79_v24  ;;  %v2865_v27 = vld [vmem:[%s4296_s1 + $0xc] sm:$0xf]  ;;  %3180 = vmatpush3.msk.msra.mxu1 %vm182_vm0, %v2800_v23  ;;  %v82_v28 = vld [vmem:[#allocation2 + $0x18] sm:$0xff]  ;;  %1508 = vst.msk [vmem:[#allocation4] sm:$0x3] %vm1507_vm3, %v3697_v2 }
  0x10   :  { %3214 = vmatmul.mubr.msk.f32.vlgmr.msra.gmra.mrb[0].mxu0 %vm58_vm2, %v80_v25  ;;  %3555 = vmatprep.subr.msk.mxu1 %vm182_vm0, %v3754_v0  ;;  %v83_v29 = vld [vmem:[#allocation2 + $0x20] sm:$0xff]  ;;  %v84_v30 = vld [vmem:[#allocation2 + $0x28] sm:$0xff]  ;;  %v85_v31 = vld [vmem:[#allocation2 + $0x30] sm:$0xff]  ;;  %1509 = vst.msk [vmem:[#allocation4 + $0x18] sm:$0x3] %vm1507_vm3, %v3697_v2  ;;  %vm3699_vm9 = vmmov 0  }
  0x11   :  { %3244 = vmatpush3.msk.msra.mxu0 %vm182_vm0, %v2843_v4  ;;  %3216 = vmatprep.mubr.msk.f32.mxu0 %vm58_vm2, %v81_v26  ;;  %v86_v32 = vld [vmem:[#allocation2 + $0x38] sm:$0xff]  ;;  %v87_v33 = vld [vmem:[#allocation2 + $0x40] sm:$0xff]  ;;  %v101_v35 = vld [vmem:[#allocation2 + $0x9] sm:$0xff]  ;;  %1510 = vst.msk [vmem:[#allocation4 + $0x12] sm:$0x3] %vm1507_vm3, %v3697_v2  ;;  %vm2062_vm10 = vcmask 162816  }
  0x12   :  { %3275 = vmatprep.subr.msk.mxu0 %vm182_vm0, %v2865_v27  ;;  %v100_v34 = vld [vmem:[#allocation2 + $0x1] sm:$0xff]  ;;  %v102_v37 = vld [vmem:[#allocation2 + $0x11] sm:$0xff]  ;;  %v103_v39 = vld [vmem:[#allocation2 + $0x19] sm:$0xff]  ;;  %1511 = vst.msk [vmem:[#allocation4 + $0x2a] sm:$0x3] %vm1507_vm3, %v3697_v2  ;;  %s3700_s16 = smov [#allocation7]  }
  0x13   :  { %v88_v36 = vld [vmem:[#allocation2 + $0x48] sm:$0xff]  ;;  %3181 = vmatprep.mubr.msk.f32.mxu1 %vm58_vm2, %v100_v34  ;;  %v89_v38 = vld [vmem:[#allocation2 + $0x58] sm:$0xff]  ;;  %v90_v41 = vld [vmem:[#allocation2 + $0x60] sm:$0xff]  ;;  %s2792_s17 = sshll.u32 %s3700_s16, 4  ;;  %s2793_s17 = int_to_ptr.vmem [resolvable:$true] %s2792_s17 }
  0x14   :  { %3217 = vmatmul.mubr.msk.f32.gmra.mrb[2].mxu0 %vm58_vm2, %v82_v28  ;;  %3182 = vmatmul.mubr.msk.f32.vlgmr.msra.gmra.mrb[0].mxu1 %vm58_vm2, %v101_v35  ;;  %v104_v40 = vld [vmem:[#allocation2 + $0x21] sm:$0xff]  ;;  %v105_v43 = vld [vmem:[#allocation2 + $0x29] sm:$0xff]  ;;  %v106_v44 = vld [vmem:[#allocation2 + $0x31] sm:$0xff]  ;;  %p3678_p1 = scmp.lt.s32.totalorder %s2793_s17, %s2793_s17 }
  0x15   :  { %3219 = vmatprep.mubr.msk.f32.mxu0 %vm58_vm2, %v83_v29  ;;  %3184 = vmatprep.mubr.msk.f32.mxu1 %vm58_vm2, %v102_v37  ;;  %v91_v42 = vld [vmem:[#allocation2 + $0x68] sm:$0xff]  ;;  %v92_v45 = vld [vmem:[#allocation2 + $0x70] sm:$0xff]  ;;  %v107_v47 = vld [vmem:[#allocation2 + $0x39] sm:$0xff] }
  0x16   :  { %3556 = vmatpush3.msk.msra.mxu1 %vm182_vm0, %v3754_v0  ;;  %v579_v46 = vld [vmem:[#allocation2 + $0x2] sm:$0xff]  ;;  %v580_v49 = vld [vmem:[#allocation2 + $0xa] sm:$0xff]  ;;  %v581_v50 = vld [vmem:[#allocation2 + $0x12] sm:$0xff] }
  0x17   :  { %v108_v48 = vld [vmem:[#allocation2 + $0x41] sm:$0xff]  ;;  %v3892_v51 = vld [vmem:[%s4296_s1 + $0x10] sm:$0xf]  ;;  %v110_v53 = vld [vmem:[#allocation2 + $0x59] sm:$0xff] }
  0x18   :  { %3220 = vmatmul.mubr.msk.f32.gmra.mrb[4].mxu0 %vm58_vm2, %v84_v30  ;;  %3185 = vmatmul.mubr.msk.f32.gmra.mrb[2].mxu1 %vm58_vm2, %v103_v39  ;;  %v109_v52 = vld [vmem:[#allocation2 + $0x49] sm:$0xff]  ;;  %v582_v54 = vld [vmem:[#allocation2 + $0x1a] sm:$0xff]  ;;  %v585_v59 = vld [vmem:[#allocation2 + $0x32] sm:$0xff] }
  0x19   :  { %3222 = vmatprep.mubr.msk.f32.mxu0 %vm58_vm2, %v85_v31  ;;  %3187 = vmatprep.mubr.msk.f32.mxu1 %vm58_vm2, %v104_v40  ;;  %v583_v55 = vld [vmem:[#allocation2 + $0x22] sm:$0xff]  ;;  %v584_v58 = vld [vmem:[#allocation2 + $0x2a] sm:$0xff]  ;;  %v114_v61 = vld [vmem:[#allocation2 + $0x79] sm:$0xff] }
  0x1a   :  { %v111_v56 = vld [vmem:[#allocation2 + $0x61] sm:$0xff]  ;;  %v112_v57 = vld [vmem:[#allocation2 + $0x69] sm:$0xff]  ;;  %v113_v60 = vld [vmem:[#allocation2 + $0x71] sm:$0xff] }
  0x1b   :  { %v586_v62 = vld [vmem:[#allocation2 + $0x3a] sm:$0xff]  ;;  %v587_v63 = vld [vmem:[#allocation2 + $0x42] sm:$0xff]  ;;  %v588_v3 = vld [vmem:[#allocation2 + $0x4a] sm:$0xff] }
  0x1c   :  { %3223 = vmatmul.mubr.msk.f32.gmra.mrb[6].mxu0 %vm58_vm2, %v86_v32  ;;  %3188 = vmatmul.mubr.msk.f32.gmra.mrb[4].mxu1 %vm58_vm2, %v105_v43  ;;  %v115_v0 = vld [vmem:[#allocation2 + $0x81] sm:$0xff]  ;;  %v116_v1 = vld [vmem:[#allocation2 + $0x89] sm:$0xff]  ;;  %v117_v5 = vld [vmem:[#allocation2 + $0x91] sm:$0xff] }
  0x1d   :  { %3225 = vmatprep.mubr.msk.f32.mxu0 %vm58_vm2, %v87_v33  ;;  %3190 = vmatprep.mubr.msk.f32.mxu1 %vm58_vm2, %v106_v44  ;;  %v589_v4 = vld [vmem:[#allocation2 + $0x5a] sm:$0xff]  ;;  %v590_v7 = vld [vmem:[#allocation2 + $0x62] sm:$0xff]  ;;  %v591_v8 = vld [vmem:[#allocation2 + $0x6a] sm:$0xff] }
  0x1e   :  { %v118_v6 = vld [vmem:[#allocation2 + $0x99] sm:$0xff]  ;;  %v119_v9 = vld [vmem:[#allocation2 + $0xa1] sm:$0xff]  ;;  %v595_v16 = vld [vmem:[#allocation2 + $0x8a] sm:$0xff] }
  0x1f   :  { %v93_v10 = vld [vmem:[#allocation2 + $0x78] sm:$0xff]  ;;  %v94_v13 = vld [vmem:[#allocation2 + $0x80] sm:$0xff]  ;;  %v95_v14 = vld [vmem:[#allocation2 + $0x88] sm:$0xff] }
  0x20   :  { %3226 = vmatmul.mubr.msk.f32.gmra.mrb[8].mxu0 %vm58_vm2, %v88_v36  ;;  %3191 = vmatmul.mubr.msk.f32.gmra.mrb[6].mxu1 %vm58_vm2, %v107_v47  ;;  %v592_v11 = vld [vmem:[#allocation2 + $0x72] sm:$0xff]  ;;  %v593_v12 = vld [vmem:[#allocation2 + $0x7a] sm:$0xff]  ;;  %v594_v15 = vld [vmem:[#allocation2 + $0x82] sm:$0xff] }
  0x21   :  { %3228 = vmatprep.mubr.msk.f32.mxu0 %vm58_vm2, %v89_v38  ;;  %3193 = vmatprep.mubr.msk.f32.mxu1 %vm58_vm2, %v108_v48  ;;  %v96_v17 = vld [vmem:[#allocation2 + $0x90] sm:$0xff]  ;;  %v97_v18 = vld [vmem:[#allocation2 + $0x98] sm:$0xff]  ;;  %v98_v21 = vld [vmem:[#allocation2 + $0xa0] sm:$0xff] }
  0x22   :  { %v596_v19 = vld [vmem:[#allocation2 + $0x92] sm:$0xff]  ;;  %v597_v20 = vld [vmem:[#allocation2 + $0x9a] sm:$0xff]  ;;  %v598_v22 = vld [vmem:[#allocation2 + $0xa2] sm:$0xff] }
  0x23   :  { %v849_v23 = vld [vmem:[#allocation2 + $0x3] sm:$0xff]  ;;  %v850_v24 = vld [vmem:[#allocation2 + $0xb] sm:$0xff]  ;;  %v851_v25 = vld [vmem:[#allocation2 + $0x13] sm:$0xff] }
  0x24   :  { %3229 = vmatmul.mubr.msk.f32.gmra.mrb[10].mxu0 %vm58_vm2, %v90_v41  ;;  %3194 = vmatmul.mubr.msk.f32.gmra.mrb[8].mxu1 %vm58_vm2, %v109_v52  ;;  %v852_v26 = vld [vmem:[#allocation2 + $0x1b] sm:$0xff]  ;;  %v854_v28 = vld [vmem:[#allocation2 + $0x2b] sm:$0xff]  ;;  %v855_v29 = vld [vmem:[#allocation2 + $0x33] sm:$0xff] }
  0x25   :  { %3231 = vmatprep.mubr.msk.f32.mxu0 %vm58_vm2, %v91_v42  ;;  %3196 = vmatprep.mubr.msk.f32.mxu1 %vm58_vm2, %v110_v53  ;;  %v856_v30 = vld [vmem:[#allocation2 + $0x3b] sm:$0xff]  ;;  %v857_v31 = vld [vmem:[#allocation2 + $0x43] sm:$0xff]  ;;  %v858_v32 = vld [vmem:[#allocation2 + $0x4b] sm:$0xff] }
  0x26   :  { %v859_v33 = vld [vmem:[#allocation2 + $0x5b] sm:$0xff]  ;;  %v860_v34 = vld [vmem:[#allocation2 + $0x63] sm:$0xff]  ;;  %v861_v35 = vld [vmem:[#allocation2 + $0x6b] sm:$0xff] }
  0x27   :  { %v862_v36 = vld [vmem:[#allocation2 + $0x73] sm:$0xff]  ;;  %v863_v37 = vld [vmem:[#allocation2 + $0x7b] sm:$0xff]  ;;  %v864_v38 = vld [vmem:[#allocation2 + $0x83] sm:$0xff] }
  0x28   :  { %3232 = vmatmul.mubr.msk.f32.gmra.mrb[12].mxu0 %vm58_vm2, %v92_v45  ;;  %3197 = vmatmul.mubr.msk.f32.gmra.mrb[10].mxu1 %vm58_vm2, %v111_v56  ;;  %v865_v39 = vld [vmem:[#allocation2 + $0x8b] sm:$0xff]  ;;  %v866_v40 = vld [vmem:[#allocation2 + $0x93] sm:$0xff]  ;;  %v867_v41 = vld [vmem:[#allocation2 + $0x9b] sm:$0xff] }
  0x29   :  { %3245 = vmatprep.mubr.msk.f32.mxu0 %vm58_vm2, %v579_v46  ;;  %3199 = vmatprep.mubr.msk.f32.mxu1 %vm58_vm2, %v112_v57  ;;  %v868_v42 = vld [vmem:[#allocation2 + $0xa3] sm:$0xff]  ;;  %v1120_v44 = vld [vmem:[#allocation2 + $0xc] sm:$0xff]  ;;  %v1121_v45 = vld [vmem:[#allocation2 + $0x14] sm:$0xff] }
  0x2a   :  { %v1119_v43 = vld [vmem:[#allocation2 + $0x4] sm:$0xff]  ;;  %v1122_v46 = vld [vmem:[#allocation2 + $0x1c] sm:$0xff]  ;;  %v1124_v48 = vld [vmem:[#allocation2 + $0x2c] sm:$0xff] }
  0x2b   :  { %v1123_v47 = vld [vmem:[#allocation2 + $0x24] sm:$0xff]  ;;  %v1128_v52 = vld [vmem:[#allocation2 + $0x4c] sm:$0xff]  ;;  %v1129_v53 = vld [vmem:[#allocation2 + $0x5c] sm:$0xff] }
  0x2c   :  { %3246 = vmatmul.mubr.msk.f32.vlgmr.msra.gmra.mrb[0].mxu0 %vm58_vm2, %v580_v49  ;;  %3200 = vmatmul.mubr.msk.f32.gmra.mrb[12].mxu1 %vm58_vm2, %v113_v60  ;;  %v1125_v49 = vld [vmem:[#allocation2 + $0x34] sm:$0xff]  ;;  %v1133_v57 = vld [vmem:[#allocation2 + $0x7c] sm:$0xff] }
  0x2d   :  { %3276 = vmatpush3.msk.msra.mxu0 %vm182_vm0, %v2865_v27  ;;  %3248 = vmatprep.mubr.msk.f32.mxu0 %vm58_vm2, %v581_v50  ;;  %v853_v27 = vld [vmem:[#allocation2 + $0x23] sm:$0xff]  ;;  %v1132_v56 = vld [vmem:[#allocation2 + $0x74] sm:$0xff] }
  0x2e   :  { %3307 = vmatprep.subr.msk.mxu0 %vm182_vm0, %v3892_v51  ;;  %3202 = vmatprep.mubr.msk.f32.mxu1 %vm58_vm2, %v114_v61  ;;  %v1126_v50 = vld [vmem:[#allocation2 + $0x3c] sm:$0xff]  ;;  %v1136_v60 = vld [vmem:[#allocation2 + $0x94] sm:$0xff] }
  0x2f   :  { %v1137_v61 = vld [vmem:[#allocation2 + $0x9c] sm:$0xff] }
  0x30   :  { %3249 = vmatmul.mubr.msk.f32.gmra.mrb[2].mxu0 %vm58_vm2, %v582_v54  ;;  %3203 = vmatmul.mubr.msk.f32.gmra.mrb[14].mxu1 %vm58_vm2, %v115_v0  ;;  %v1130_v54 = vld [vmem:[#allocation2 + $0x64] sm:$0xff] }
  0x31   :  { %3251 = vmatprep.mubr.msk.f32.mxu0 %vm58_vm2, %v583_v55  ;;  %3205 = vmatprep.mubr.msk.f32.mxu1 %vm58_vm2, %v116_v1  ;;  %v1131_v55 = vld [vmem:[#allocation2 + $0x6c] sm:$0xff] }
  0x34   :  { %3252 = vmatmul.mubr.msk.f32.gmra.mrb[4].mxu0 %vm58_vm2, %v584_v58  ;;  %3206 = vmatmul.mubr.msk.f32.gmra.mrb[16].mxu1 %vm58_vm2, %v117_v5  ;;  %v1134_v58 = vld [vmem:[#allocation2 + $0x84] sm:$0xff] }
  0x35   :  { %3254 = vmatprep.mubr.msk.f32.mxu0 %vm58_vm2, %v585_v59  ;;  %3208 = vmatprep.mubr.msk.f32.mxu1 %vm58_vm2, %v118_v6  ;;  %v1135_v59 = vld [vmem:[#allocation2 + $0x8c] sm:$0xff] }
  0x38   :  { %3255 = vmatmul.mubr.msk.f32.gmra.mrb[6].mxu0 %vm58_vm2, %v586_v62  ;;  %3209 = vmatmul.mubr.msk.f32.gmra.mrb[18].mxu1 %vm58_vm2, %v119_v9  ;;  %v1138_v62 = vld [vmem:[#allocation2 + $0xa4] sm:$0xff] }
  0x39   :  { %3257 = vmatprep.mubr.msk.f32.mxu0 %vm58_vm2, %v587_v63  ;;  %3234 = vmatprep.mubr.msk.f32.mxu1 %vm58_vm2, %v93_v10  ;;  %v2915_v10 = vld [vmem:[%s4299_s4 + $0x28] sm:$0xff] }
  0x3c   :  { %3258 = vmatmul.mubr.msk.f32.gmra.mrb[8].mxu0 %vm58_vm2, %v588_v3  ;;  %3235 = vmatmul.mubr.msk.f32.vlgmr.msra.gmra.mrb[14].mxu1 %vm58_vm2, %v94_v13 }
  0x3d   :  { %3260 = vmatprep.mubr.msk.f32.mxu0 %vm58_vm2, %v589_v4  ;;  %3237 = vmatprep.mubr.msk.f32.mxu1 %vm58_vm2, %v95_v14 }
  0x40   :  { %3261 = vmatmul.mubr.msk.f32.gmra.mrb[10].mxu0 %vm58_vm2, %v590_v7  ;;  %3238 = vmatmul.mubr.msk.f32.gmra.mrb[16].mxu1 %vm58_vm2, %v96_v17 }
  0x41   :  { %3263 = vmatprep.mubr.msk.f32.mxu0 %vm58_vm2, %v591_v8  ;;  %3240 = vmatprep.mubr.msk.f32.mxu1 %vm58_vm2, %v97_v18 }
  0x44   :  { %3264 = vmatmul.mubr.msk.f32.gmra.mrb[12].mxu0 %vm58_vm2, %v592_v11  ;;  %3241 = vmatmul.mubr.msk.f32.gmra.mrb[18].mxu1 %vm58_vm2, %v98_v21  ;;  %v2916_v11 = vld [vmem:[%s4299_s4 + $0x30] sm:$0xff] }
  0x45   :  { %3266 = vmatprep.mubr.msk.f32.mxu0 %vm58_vm2, %v593_v12  ;;  %v3491_v12 = vpack.c.bf16 %v2916_v11, %v2915_v10 }
  0x47   :  { %3492 = vmatprep.subr.bf16.mxu1 %v3491_v12 }
  0x48   :  { %3267 = vmatmul.mubr.msk.f32.gmra.mrb[14].mxu0 %vm58_vm2, %v594_v15  ;;  %3494 = vmatpush3.bf16.msra.mxu1 %v3491_v12  ;;  %v2917_v15 = vld [vmem:[%s4299_s4 + $0x38] sm:$0xff] }
  0x49   :  { %3269 = vmatprep.mubr.msk.f32.mxu0 %vm58_vm2, %v595_v16  ;;  %v2918_v16 = vld [vmem:[%s4299_s4 + $0x40] sm:$0xff] }
  0x4a   :  { %v3495_v17 = vpack.c.bf16 %v2918_v16, %v2917_v15 }
  0x4c   :  { %3270 = vmatmul.mubr.msk.f32.gmra.mrb[16].mxu0 %vm58_vm2, %v596_v19  ;;  %3496 = vmatprep.subr.bf16.mxu1 %v3495_v17 }
  0x4d   :  { %3272 = vmatprep.mubr.msk.f32.mxu0 %vm58_vm2, %v597_v20  ;;  %3498 = vmatpush3.bf16.msra.mxu1 %v3495_v17  ;;  %v2919_v20 = vld [vmem:[%s4299_s4 + $0x48] sm:$0xff] }
  0x4e   :  { %3347 = vmatprep.subr.mxu1 %v2919_v20 }
  0x50   :  { %3273 = vmatmul.mubr.msk.f32.gmra.mrb[18].mxu0 %vm58_vm2, %v598_v22 }
  0x51   :  { %3277 = vmatprep.mubr.msk.f32.mxu0 %vm58_vm2, %v849_v23  ;;  %3348 = vmatpush3.msra.mxu1 %v2919_v20  ;;  %v1520_v23 = vld [vmem:[%s4299_s4] sm:$0xff] }
  0x54   :  { %3278 = vmatmul.mubr.msk.f32.vlgmr.msra.gmra.mrb[0].mxu0 %vm58_vm2, %v850_v24  ;;  %v1521_v24 = vld [vmem:[%s4299_s4 + $0x8] sm:$0xff] }
  0x55   :  { %3308 = vmatpush3.msk.msra.mxu0 %vm182_vm0, %v3892_v51  ;;  %3280 = vmatprep.mubr.msk.f32.mxu0 %vm58_vm2, %v851_v25  ;;  %v1127_v51 = vld [vmem:[#allocation2 + $0x44] sm:$0xff]  ;;  %v4009_v25 = vpack.c.bf16 %v1521_v24, %v1520_v23 }
  0x57   :  { %3500 = vmatprep.subr.bf16.mxu1 %v4009_v25 }
  0x58   :  { %3281 = vmatmul.mubr.msk.f32.gmra.mrb[2].mxu0 %vm58_vm2, %v852_v26 }
  0x59   :  { %3283 = vmatprep.mubr.msk.f32.mxu0 %vm58_vm2, %v853_v27 }
  0x5c   :  { %3284 = vmatmul.mubr.msk.f32.gmra.mrb[4].mxu0 %vm58_vm2, %v854_v28 }
  0x5d   :  { %3286 = vmatprep.mubr.msk.f32.mxu0 %vm58_vm2, %v855_v29 }
  0x60   :  { %3287 = vmatmul.mubr.msk.f32.gmra.mrb[6].mxu0 %vm58_vm2, %v856_v30 }
  0x61   :  { %3289 = vmatprep.mubr.msk.f32.mxu0 %vm58_vm2, %v857_v31 }
  0x64   :  { %3290 = vmatmul.mubr.msk.f32.gmra.mrb[8].mxu0 %vm58_vm2, %v858_v32 }
  0x65   :  { %3292 = vmatprep.mubr.msk.f32.mxu0 %vm58_vm2, %v859_v33 }
  0x68   :  { %3293 = vmatmul.mubr.msk.f32.gmra.mrb[10].mxu0 %vm58_vm2, %v860_v34 }
  0x69   :  { %3295 = vmatprep.mubr.msk.f32.mxu0 %vm58_vm2, %v861_v35 }
  0x6c   :  { %3296 = vmatmul.mubr.msk.f32.gmra.mrb[12].mxu0 %vm58_vm2, %v862_v36 }
  0x6d   :  { %3298 = vmatprep.mubr.msk.f32.mxu0 %vm58_vm2, %v863_v37 }
  0x70   :  { %3299 = vmatmul.mubr.msk.f32.gmra.mrb[14].mxu0 %vm58_vm2, %v864_v38 }
  0x71   :  { %3301 = vmatprep.mubr.msk.f32.mxu0 %vm58_vm2, %v865_v39 }
  0x74   :  { %3302 = vmatmul.mubr.msk.f32.gmra.mrb[16].mxu0 %vm58_vm2, %v866_v40 }
  0x75   :  { %3304 = vmatprep.mubr.msk.f32.mxu0 %vm58_vm2, %v867_v41 }
  0x78   :  { %3305 = vmatmul.mubr.msk.f32.gmra.mrb[18].mxu0 %vm58_vm2, %v868_v42 }
  0x79   :  { %3309 = vmatprep.mubr.msk.f32.mxu0 %vm58_vm2, %v1119_v43 }
  0x7c   :  { %3310 = vmatmul.mubr.msk.f32.vlgmr.msra.gmra.mrb[0].mxu0 %vm58_vm2, %v1120_v44 }
  0x7d   :  { %3312 = vmatprep.mubr.msk.f32.mxu0 %vm58_vm2, %v1121_v45 }
  0x80   :  { %3313 = vmatmul.mubr.msk.f32.gmra.mrb[2].mxu0 %vm58_vm2, %v1122_v46 }
  0x81   :  { %3315 = vmatprep.mubr.msk.f32.mxu0 %vm58_vm2, %v1123_v47 }
  0x84   :  { %3316 = vmatmul.mubr.msk.f32.gmra.mrb[4].mxu0 %vm58_vm2, %v1124_v48 }
  0x85   :  { %3318 = vmatprep.mubr.msk.f32.mxu0 %vm58_vm2, %v1125_v49 }
  0x88   :  { %3319 = vmatmul.mubr.msk.f32.gmra.mrb[6].mxu0 %vm58_vm2, %v1126_v50 }
  0x89   :  { %3321 = vmatprep.mubr.msk.f32.mxu0 %vm58_vm2, %v1127_v51 }
  0x8c   :  { %3322 = vmatmul.mubr.msk.f32.gmra.mrb[8].mxu0 %vm58_vm2, %v1128_v52 }
  0x8d   :  { %3324 = vmatprep.mubr.msk.f32.mxu0 %vm58_vm2, %v1129_v53 }
  0x90   :  { %3325 = vmatmul.mubr.msk.f32.gmra.mrb[10].mxu0 %vm58_vm2, %v1130_v54 }
  0x91   :  { %3327 = vmatprep.mubr.msk.f32.mxu0 %vm58_vm2, %v1131_v55 }
  0x94   :  { %3328 = vmatmul.mubr.msk.f32.gmra.mrb[12].mxu0 %vm58_vm2, %v1132_v56 }
  0x95   :  { %3330 = vmatprep.mubr.msk.f32.mxu0 %vm58_vm2, %v1133_v57 }
  0x98   :  { %3331 = vmatmul.mubr.msk.f32.gmra.mrb[14].mxu0 %vm58_vm2, %v1134_v58 }
  0x99   :  { %3333 = vmatprep.mubr.msk.f32.mxu0 %vm58_vm2, %v1135_v59 }
  0x9c   :  { %3334 = vmatmul.mubr.msk.f32.gmra.mrb[16].mxu0 %vm58_vm2, %v1136_v60 }
  0x9d   :  { %3336 = vmatprep.mubr.msk.f32.mxu0 %vm58_vm2, %v1137_v61 }
  0xa0   :  { %3337 = vmatmul.mubr.msk.f32.gmra.mrb[18].mxu0 %vm58_vm2, %v1138_v62 }
  0xe7   :  { %v3183_v63 = vpop.f32.mrb[0].mxu1 }
  0xe8   :  { %v252_v0 = vpop.f32.mrb[1].mxu1 }
  0xeb   :  { %v3186_v1 = vpop.f32.mrb[2].mxu1 }
  0xec   :  { %v262_v3 = vpop.f32.mrb[3].mxu1 }
  0xef   :  { %v3189_v4 = vpop.f32.mrb[4].mxu1 }
  0xf0   :  { %v272_v5 = vpop.f32.mrb[5].mxu1 }
  0xf3   :  { %v3192_v6 = vpop.f32.mrb[6].mxu1 }
  0xf4   :  { %v282_v7 = vpop.f32.mrb[7].mxu1 }
  0xf7   :  { %v3195_v8 = vpop.f32.mrb[8].mxu1 }
  0xf8   :  { %v292_v9 = vpop.f32.mrb[9].mxu1 }
  0xfb   :  { %v3198_v13 = vpop.f32.mrb[10].mxu1 }
  0xfc   :  { %v302_v14 = vpop.f32.mrb[11].mxu1 }
  0xff   :  { %v3992_v18 = vpop.f32.mrb[12].mxu1 }
 0x100   :  { %v3994_v19 = vpop.f32.mrb[13].mxu1 }
 0x10f   :  { %v3999_v21 = vpop.f32.mrb[14].mxu1 }
 0x110   :  { %v4001_v22 = vpop.f32.mrb[15].mxu1 }
 0x113   :  { %v4011_v26 = vpop.f32.mrb[16].mxu1 }
 0x114   :  { %v4014_v27 = vpop.f32.mrb[17].mxu1 }
 0x117   :  { %v4016_v28 = vpop.f32.mrb[18].mxu1 }
 0x118   :  { %v4018_v29 = vpop.f32.mrb[19].mxu1 }
 0x14f   :  { %v3311_v30 = vpop.f32.mrb[0].mxu0 }
 0x150   :  { %v3557_v31 = vadd.f32 %v3311_v30, %v3183_v63  ;;  %v1270_v32 = vpop.f32.mrb[1].mxu0  ;;  %v4035_v63 = vld [vmem:[%s4297_s2] ss:$0 sm:$0xff] }
 0x151   :  { %v3558_v33 = vadd.f32 %v1270_v32, %v252_v0 }
 0x152   :  { %1391 = vst.msk [vmem:[#allocation3 + $0x8] sm:$0xff] %vm1389_vm4, %v3557_v31 }
 0x153   :  { %1390 = vst.msk [vmem:[#allocation3] sm:$0xff] %vm1389_vm4, %v3558_v33  ;;  %v3314_v34 = vpop.f32.mrb[2].mxu0 }
 0x154   :  { %v3559_v35 = vadd.f32 %v3314_v34, %v3186_v1  ;;  %v1280_v36 = vpop.f32.mrb[3].mxu0 }
 0x155   :  { %v3560_v37 = vadd.f32 %v1280_v36, %v262_v3 }
 0x156   :  { %1393 = vst.msk [vmem:[#allocation3 + $0x18] sm:$0xff] %vm1389_vm4, %v3559_v35 }
 0x157   :  { %1392 = vst.msk [vmem:[#allocation3 + $0x10] sm:$0xff] %vm1389_vm4, %v3560_v37  ;;  %v3317_v38 = vpop.f32.mrb[4].mxu0 }
 0x158   :  { %v3561_v39 = vadd.f32 %v3317_v38, %v3189_v4  ;;  %v1290_v40 = vpop.f32.mrb[5].mxu0 }
 0x159   :  { %v3562_v41 = vadd.f32 %v1290_v40, %v272_v5  ;;  %v4042_v5 = vld [vmem:[%s4298_s3] ss:$0 sm:$0xff] }
 0x15a   :  { %1395 = vst.msk [vmem:[#allocation3 + $0x28] sm:$0xff] %vm1389_vm4, %v3561_v39 }
 0x15b   :  { %1394 = vst.msk [vmem:[#allocation3 + $0x20] sm:$0xff] %vm1389_vm4, %v3562_v41  ;;  %v3320_v42 = vpop.f32.mrb[6].mxu0 }
 0x15c   :  { %v3563_v43 = vadd.f32 %v3320_v42, %v3192_v6  ;;  %v1300_v44 = vpop.f32.mrb[7].mxu0 }
 0x15d   :  { %v3564_v45 = vadd.f32 %v1300_v44, %v282_v7 }
 0x15e   :  { %1397 = vst.msk [vmem:[#allocation3 + $0x38] sm:$0xff] %vm1389_vm4, %v3563_v43 }
 0x15f   :  { %1396 = vst.msk [vmem:[#allocation3 + $0x30] sm:$0xff] %vm1389_vm4, %v3564_v45  ;;  %v3323_v46 = vpop.f32.mrb[8].mxu0 }
 0x160   :  { %v3565_v47 = vadd.f32 %v3323_v46, %v3195_v8  ;;  %v1310_v48 = vpop.f32.mrb[9].mxu0 }
 0x161   :  { %v3566_v49 = vadd.f32 %v1310_v48, %v292_v9 }
 0x162   :  { %v1410_v50 = vld [vmem:[#allocation3] ss:$5 sm:$0xff]  ;;  %v1418_v51 = vld [vmem:[#allocation3 + $0x1] ss:$5 sm:$0xff]  ;;  %1399 = vst.msk [vmem:[#allocation3 + $0x48] sm:$0xff] %vm1389_vm4, %v3565_v47 }
 0x163   :  { %v1425_v52 = vmax.f32 %v1410_v50, %v1418_v51  ;;  %1398 = vst.msk [vmem:[#allocation3 + $0x40] sm:$0xff] %vm1389_vm4, %v3566_v49  ;;  %v3326_v53 = vpop.f32.mrb[10].mxu0  ;;  %v1430_v54 = vld [vmem:[#allocation3 + $0x2] ss:$5 sm:$0xff]  ;;  %v1442_v59 = vld [vmem:[#allocation3 + $0x3] ss:$5 sm:$0xff] }
 0x164   :  { %v3567_v55 = vadd.f32 %v3326_v53, %v3198_v13  ;;  %v1320_v56 = vpop.f32.mrb[11].mxu0  ;;  %v1454_v62 = vld [vmem:[#allocation3 + $0x4] ss:$5 sm:$0xff] }
 0x165   :  { %v1437_v57 = vmax.f32 %v1425_v52, %v1430_v54  ;;  %v3568_v58 = vadd.f32 %v1320_v56, %v302_v14 }
 0x166   :  { %1401 = vst.msk [vmem:[#allocation3 + $0x58] sm:$0xff] %vm1389_vm4, %v3567_v55 }
 0x167   :  { %v1449_v60 = vmax.f32 %v1437_v57, %v1442_v59  ;;  %1400 = vst.msk [vmem:[#allocation3 + $0x50] sm:$0xff] %vm1389_vm4, %v3568_v58  ;;  %v3329_v61 = vpop.f32.mrb[12].mxu0 }
 0x168   :  { %v3569_v0 = vadd.f32 %v3329_v61, %v3992_v18  ;;  %v1330_v1 = vpop.f32.mrb[13].mxu0 }
 0x169   :  { %v1461_v3 = vmax.f32 %v1449_v60, %v1454_v62  ;;  %v3570_v4 = vadd.f32 %v1330_v1, %v3994_v19  ;;  %v1522_v1 = vld [vmem:[%s4299_s4 + $0x10] sm:$0xff] }
 0x16a   :  { %v1412_v6 = vld [vmem:[#allocation3 + $0x28] ss:$5 sm:$0xff]  ;;  %v1420_v7 = vld [vmem:[#allocation3 + $0x29] ss:$5 sm:$0xff]  ;;  %1403 = vst.msk [vmem:[#allocation3 + $0x68] sm:$0xff] %vm1389_vm4, %v3569_v0 }
 0x16b   :  { %v1472_v8 = vmul.f32 %v4035_v63, %v1461_v3  ;;  %v1426_v9 = vmax.f32 %v1412_v6, %v1420_v7  ;;  %1402 = vst.msk [vmem:[#allocation3 + $0x60] sm:$0xff] %vm1389_vm4, %v3570_v4  ;;  %v3332_v10 = vpop.f32.mrb[14].mxu0  ;;  %v1432_v11 = vld [vmem:[#allocation3 + $0x2a] ss:$5 sm:$0xff]  ;;  %v1444_v17 = vld [vmem:[#allocation3 + $0x2b] ss:$5 sm:$0xff] }
 0x16c   :  { %v3571_v12 = vadd.f32 %v3332_v10, %v3999_v21  ;;  %v1340_v13 = vpop.f32.mrb[15].mxu0  ;;  %v1456_v23 = vld [vmem:[#allocation3 + $0x2c] ss:$5 sm:$0xff] }
 0x16d   :  { %v1483_v14 = vadd.f32 %v4042_v5, %v1472_v8  ;;  %v1438_v15 = vmax.f32 %v1426_v9, %v1432_v11  ;;  %v3572_v16 = vadd.f32 %v1340_v13, %v4001_v22  ;;  %v1523_v3 = vld [vmem:[%s4299_s4 + $0x18] sm:$0xff]  ;;  %v1524_v9 = vld [vmem:[%s4299_s4 + $0x20] sm:$0xff]  ;;  %v2928_v10 = vld [vmem:[%s4299_s4 + $0x50] sm:$0xff] }
 0x16e   :  { %1405 = vst.msk [vmem:[#allocation3 + $0x78] sm:$0xff] %vm1389_vm4, %v3571_v12  ;;  %v3503_v6 = vpack.c.bf16 %v1523_v3, %v1522_v1  ;;  %v2929_v11 = vld [vmem:[%s4299_s4 + $0x58] sm:$0xff]  ;;  %v2956_v3 = vld [vmem:[%s4301_s6] ss:$0 sm:$0xff] }
 0x16f   :  { %v1491_v18 = vmul.f32 1.442695, %v1483_v14  ;;  %v1450_v19 = vmax.f32 %v1438_v15, %v1444_v17  ;;  %1404 = vst.msk [vmem:[#allocation3 + $0x70] sm:$0xff] %vm1389_vm4, %v3572_v16  ;;  %v3335_v20 = vpop.f32.mrb[16].mxu0  ;;  %vm1487_vm5 = vcmp.gt.f32.partialorder %v1483_v14, 0.0  ;;  %v2930_v17 = vld [vmem:[%s4299_s4 + $0x60] sm:$0xff] }
 0x170   :  { %v3573_v24 = vadd.f32 %v3335_v20, %v4011_v26  ;;  %v1350_v30 = vpop.f32.mrb[17].mxu0 }
 0x171   :  { %v1462_v31 = vmax.f32 %v1450_v19, %v1456_v23  ;;  %v3574_v21 = vadd.f32 %v1350_v30, %v4014_v27  ;;  %3657 = vpow2.f32 %v1491_v18  ;;  %v2931_v18 = vld [vmem:[%s4299_s4 + $0x68] sm:$0xff]  ;;  %v2932_v30 = vld [vmem:[%s4299_s4 + $0x70] sm:$0xff] }
 0x172   :  { %1407 = vst.msk [vmem:[#allocation3 + $0x88] sm:$0xff] %vm1389_vm4, %v3573_v24  ;;  %v3511_v20 = vpack.c.bf16 %v2931_v18, %v2930_v17  ;;  %v2107_v17 = vld [vmem:[%s4302_s7] sm:$0xff]  ;;  %v2108_v18 = vld [vmem:[%s4302_s7 + $0x8] sm:$0xff] }
 0x173   :  { %v1473_v22 = vmul.f32 %v4035_v63, %v1462_v31  ;;  %1406 = vst.msk [vmem:[#allocation3 + $0x80] sm:$0xff] %vm1389_vm4, %v3574_v21  ;;  %v3338_v32 = vpop.f32.mrb[18].mxu0  ;;  %v2937_v21 = vld [vmem:[%s4299_s4 + $0x78] sm:$0xff] }
 0x174   :  { %v3575_v33 = vadd.f32 %v3338_v32, %v4016_v28  ;;  %v1360_v34 = vpop.f32.mrb[19].mxu0 }
 0x175   :  { %v1484_v35 = vadd.f32 %v4042_v5, %v1473_v22  ;;  %v3576_v36 = vadd.f32 %v1360_v34, %v4018_v29  ;;  %v2938_v22 = vld [vmem:[%s4299_s4 + $0x80] sm:$0xff]  ;;  %v2940_v34 = vld [vmem:[%s4299_s4 + $0x90] sm:$0xff] }
 0x176   :  { %v1414_v26 = vld [vmem:[#allocation3 + $0x50] ss:$5 sm:$0xff]  ;;  %v1422_v37 = vld [vmem:[#allocation3 + $0x51] ss:$5 sm:$0xff]  ;;  %1409 = vst.msk [vmem:[#allocation3 + $0x98] sm:$0xff] %vm1389_vm4, %v3575_v33 }
 0x177   :  { %v1493_v27 = vmul.f32 1.442695, %v1484_v35  ;;  %v1427_v38 = vmax.f32 %v1414_v26, %v1422_v37  ;;  %1408 = vst.msk [vmem:[#allocation3 + $0x90] sm:$0xff] %vm1389_vm4, %v3576_v36  ;;  %v1434_v39 = vld [vmem:[#allocation3 + $0x52] ss:$5 sm:$0xff]  ;;  %vm1488_vm6 = vcmp.gt.f32.partialorder %v1484_v35, 0.0 }
 0x178   :  { %v1446_v41 = vld [vmem:[#allocation3 + $0x53] ss:$5 sm:$0xff]  ;;  %v1458_v28 = vld [vmem:[#allocation3 + $0x54] ss:$5 sm:$0xff] }
 0x179   :  { %3659 = vpow2.f32 %v1493_v27  ;;  %v1439_v40 = vmax.f32 %v1427_v38, %v1434_v39  ;;  %v2939_v33 = vld [vmem:[%s4299_s4 + $0x88] sm:$0xff]  ;;  %v2941_v27 = vld [vmem:[%s4299_s4 + $0x98] sm:$0xff]  ;;  %v2946_v39 = vld [vmem:[%s4299_s4 + $0xa0] sm:$0xff] }
 0x17a   :  { %v3519_v36 = vpack.c.bf16 %v2940_v34, %v2939_v33  ;;  %v2968_v33 = vld [vmem:[%s4302_s7 + $0x40] sm:$0xf] }
 0x17b   :  { %v3658_v42 = vpop.eup %3657  ;;  %v1451_v43 = vmax.f32 %v1439_v40, %v1446_v41  ;;  %v2947_v40 = vld [vmem:[%s4299_s4 + $0xa8] sm:$0xff] }
 0x17c   :  { %v2911_v44 = vadd.f32 -1.0, %v3658_v42  ;;  %v2948_v42 = vld [vmem:[%s4299_s4 + $0xb0] sm:$0xff] }
 0x17d   :  { %v1463_v45 = vmax.f32 %v1451_v43, %v1458_v28  ;;  %v2949_v43 = vld [vmem:[%s4299_s4 + $0xb8] sm:$0xff]  ;;  %v3523_v28 = vpack.c.bf16 %v2947_v40, %v2946_v39  ;;  %v2982_v40 = vld [vmem:[%s4302_s7 + $0x80] sm:$0xff] }
 0x17e   :  { %v1416_v46 = vld [vmem:[#allocation3 + $0x78] ss:$5 sm:$0xff]  ;;  %v1424_v29 = vld [vmem:[#allocation3 + $0x79] ss:$5 sm:$0xff]  ;;  %v1503_v47 = vsel %vm1487_vm5, %v1483_v14, %v2911_v44  ;;  %v3527_v44 = vpack.c.bf16 %v2949_v43, %v2948_v42 }
 0x17f   :  { %v1474_v48 = vmul.f32 %v4035_v63, %v1463_v45  ;;  %v1428_v49 = vmax.f32 %v1416_v46, %v1424_v29  ;;  %1512 = vst.msk [vmem:[#allocation4 + $0x2] sm:$0xff] %vm1389_vm4, %v1503_v47  ;;  %v1436_v50 = vld [vmem:[#allocation3 + $0x7a] ss:$5 sm:$0xff]  ;;  %v1448_v53 = vld [vmem:[#allocation3 + $0x7b] ss:$5 sm:$0xff] }
 0x180   :  { %v1460_v57 = vld [vmem:[#allocation3 + $0x7c] ss:$5 sm:$0xff] }
 0x181   :  { %v1485_v51 = vadd.f32 %v4042_v5, %v1474_v48  ;;  %v1440_v52 = vmax.f32 %v1428_v49, %v1436_v50  ;;  %v2950_v47 = vld [vmem:[%s4299_s4 + $0xc0] sm:$0xff]  ;;  %v2981_v39 = vld [vmem:[%s4302_s7 + $0x78] sm:$0xff] }
 0x182   :  { %v3547_v42 = vpack.c.bf16 %v2982_v40, %v2981_v39 }
 0x183   :  { %v3660_v54 = vpop.eup %3659  ;;  %v1495_v55 = vmul.f32 1.442695, %v1485_v51  ;;  %v1452_v56 = vmax.f32 %v1440_v52, %v1448_v53  ;;  %vm1489_vm7 = vcmp.gt.f32.partialorder %v1485_v51, 0.0  ;;  %v2959_v52 = vld [vmem:[%s4302_s7 + $0x18] sm:$0xff]  ;;  %v2960_v53 = vld [vmem:[%s4302_s7 + $0x20] sm:$0xff] }
 0x184   :  { %v2912_v58 = vadd.f32 -1.0, %v3660_v54  ;;  %v3698_v54 = vmov 0.0|0.0  }
 0x185   :  { %v1464_v59 = vmax.f32 %v1452_v56, %v1460_v57  ;;  %3661 = vpow2.f32 %v1495_v55  ;;  %v3532_v55 = vpack.c.bf16 %v2960_v53, %v2959_v52  ;;  %v2961_v56 = vld [vmem:[%s4302_s7 + $0x28] sm:$0xf]  ;;  %v2993_v52 = vld [vmem:[%s4302_s7 + $0xb8] sm:$0xf] }
 0x186   :  { %v1525_v60 = vld [vmem:[#allocation4 + $0x1] sm:$0xff]  ;;  %v1504_v61 = vsel %vm1488_vm6, %v1484_v35, %v2912_v58  ;;  %v3515_v35 = vpack.c.bf16 %v2938_v22, %v2937_v21  ;;  %v2971_v22 = vld [vmem:[%s4302_s7 + $0x48] sm:$0xff] }
 0x187   :  { %v1475_v62 = vmul.f32 %v4035_v63, %v1464_v59  ;;  %3349 = vmatprep.mubr.msk.f32.mxu1 %vm1389_vm4, %v1525_v60  ;;  %1513 = vst.msk [vmem:[#allocation4 + $0xa] sm:$0xff] %vm1389_vm4, %v1504_v61  ;;  %v1516_v19 = vld [vmem:[#allocation4] sm:$0xff] }
 0x188   :  { %v1729_v32 = vld [vmem:[#allocation4 + $0x2] sm:$0xff] }
 0x189   :  { %v1486_v0 = vadd.f32 %v4042_v5, %v1475_v62 }
 0x18b   :  { %v1497_v4 = vmul.f32 1.442695, %v1486_v0  ;;  %vm1490_vm8 = vcmp.gt.f32.partialorder %v1486_v0, 0.0 }
 0x18d   :  { %3663 = vpow2.f32 %v1497_v4 }
 0x18e   :  { %v1526_v7 = vld [vmem:[#allocation4 + $0x9] sm:$0xff] }
 0x18f   :  { %v3662_v8 = vpop.eup %3661  ;;  %3350 = vmatmul.mubr.msk.f32.vlgmr.msra.gmra.mrb[20].mxu1 %vm1389_vm4, %v1526_v7  ;;  %v1517_v23 = vld [vmem:[#allocation4 + $0x8] sm:$0xff] }
 0x190   :  { %v2913_v63 = vadd.f32 -1.0, %v3662_v8  ;;  %3502 = vmatpush3.bf16.msra.mxu1 %v4009_v25  ;;  %v3507_v25 = vpack.c.bf16 %v2929_v11, %v2928_v10  ;;  %v1730_v26 = vld [vmem:[#allocation4 + $0xa] sm:$0xff] }
 0x191   :  { %3504 = vmatprep.subr.bf16.mxu1 %v3503_v6  ;;  %v1840_v41 = vld [vmem:[#allocation4 + $0x3] sm:$0xff]  ;;  %v1841_v45 = vld [vmem:[#allocation4 + $0xb] sm:$0xff] }
 0x192   :  { %v1505_v5 = vsel %vm1489_vm7, %v1485_v51, %v2913_v63  ;;  %v1951_v48 = vld [vmem:[#allocation4 + $0x4] sm:$0xff]  ;;  %v1952_v49 = vld [vmem:[#allocation4 + $0xc] sm:$0xff] }
 0x193   :  { %1514 = vst.msk [vmem:[#allocation4 + $0x1a] sm:$0xff] %vm1389_vm4, %v1505_v5 }
 0x194   :  { %3506 = vmatpush3.bf16.msra.mxu1 %v3503_v6 }
 0x195   :  { %3363 = vmatprep.subr.mxu1 %v1524_v9 }
 0x197   :  { %v3664_v12 = vpop.eup %3663 }
 0x198   :  { %v2914_v13 = vadd.f32 -1.0, %v3664_v12  ;;  %3364 = vmatpush3.msra.mxu1 %v1524_v9 }
 0x199   :  { %3508 = vmatprep.subr.bf16.mxu1 %v3507_v25 }
 0x19a   :  { %v1527_v14 = vld [vmem:[#allocation4 + $0x19] sm:$0xff]  ;;  %v1506_v15 = vsel %vm1490_vm8, %v1486_v0, %v2914_v13  ;;  %v2955_v0 = vld [vmem:[%s4300_s5] ss:$0 sm:$0xff] }
 0x19b   :  { %3352 = vmatprep.mubr.msk.f32.mxu1 %vm1389_vm4, %v1527_v14  ;;  %1515 = vst.msk [vmem:[#allocation4 + $0x22] sm:$0xff] %vm1389_vm4, %v1506_v15  ;;  %v1518_v24 = vld [vmem:[#allocation4 + $0x18] sm:$0xff] }
 0x19c   :  { %v1731_v37 = vld [vmem:[#allocation4 + $0x1a] sm:$0xff] }
 0x1a2   :  { %v1528_v16 = vld [vmem:[#allocation4 + $0x21] sm:$0xff] }
 0x1a3   :  { %3353 = vmatmul.mubr.msk.f32.gmra.mrb[22].mxu1 %vm1389_vm4, %v1528_v16  ;;  %v1519_v31 = vld [vmem:[#allocation4 + $0x20] sm:$0xff] }
 0x1a4   :  { %3365 = vmatprep.mubr.msk.f32.mxu1 %vm1389_vm4, %v1516_v19  ;;  %v1732_v38 = vld [vmem:[#allocation4 + $0x22] sm:$0xff]  ;;  %v3535_v19 = vpack.c.bf16 %v2108_v18, %v2107_v17 }
 0x1a5   :  { %v1842_v46 = vld [vmem:[#allocation4 + $0x1b] sm:$0xff]  ;;  %v1843_v29 = vld [vmem:[#allocation4 + $0x23] sm:$0xff] }
 0x1a6   :  { %v1953_v50 = vld [vmem:[#allocation4 + $0x1c] sm:$0xff]  ;;  %v1954_v51 = vld [vmem:[#allocation4 + $0x24] sm:$0xff] }
 0x1a7   :  { %3366 = vmatmul.mubr.msk.f32.vlgmr.msra.gmra.mrb[20].mxu1 %vm1389_vm4, %v1517_v23  ;;  %v2966_v23 = vld [vmem:[%s4302_s7 + $0x30] sm:$0xff] }
 0x1a8   :  { %3510 = vmatpush3.bf16.msra.mxu1 %v3507_v25  ;;  %3368 = vmatprep.mubr.msk.f32.mxu1 %vm1389_vm4, %v1518_v24  ;;  %v2967_v24 = vld [vmem:[%s4302_s7 + $0x38] sm:$0xff] }
 0x1a9   :  { %3512 = vmatprep.subr.bf16.mxu1 %v3511_v20 }
 0x1ab   :  { %3369 = vmatmul.mubr.msk.f32.gmra.mrb[22].mxu1 %vm1389_vm4, %v1519_v31  ;;  %v3538_v31 = vpack.c.bf16 %v2967_v24, %v2966_v23 }
 0x1ac   :  { %3514 = vmatpush3.bf16.msra.mxu1 %v3511_v20  ;;  %3381 = vmatprep.mubr.msk.f32.mxu1 %vm1389_vm4, %v1729_v32  ;;  %v2972_v32 = vld [vmem:[%s4302_s7 + $0x50] sm:$0xff] }
 0x1ad   :  { %3379 = vmatprep.subr.mxu1 %v2932_v30  ;;  %v3541_v34 = vpack.c.bf16 %v2972_v32, %v2971_v22 }
 0x1b0   :  { %3380 = vmatpush3.msra.mxu1 %v2932_v30  ;;  %v2109_v30 = vld [vmem:[%s4302_s7 + $0x10] sm:$0xf] }
 0x1b1   :  { %3382 = vmatmul.mubr.msk.f32.vlgmr.msra.gmra.mrb[20].mxu1 %vm1389_vm4, %v1730_v26  ;;  %3516 = vmatprep.subr.bf16.mxu1 %v3515_v35  ;;  %v2977_v26 = vld [vmem:[%s4302_s7 + $0x68] sm:$0xff] }
 0x1b2   :  { %3384 = vmatprep.mubr.msk.f32.mxu1 %vm1389_vm4, %v1731_v37  ;;  %3518 = vmatpush3.bf16.msra.mxu1 %v3515_v35  ;;  %v2973_v37 = vld [vmem:[%s4302_s7 + $0x58] sm:$0xf] }
 0x1b3   :  { %3520 = vmatprep.subr.bf16.mxu1 %v3519_v36 }
 0x1b5   :  { %3385 = vmatmul.mubr.msk.f32.gmra.mrb[22].mxu1 %vm1389_vm4, %v1732_v38 }
 0x1b6   :  { %3522 = vmatpush3.bf16.msra.mxu1 %v3519_v36  ;;  %3397 = vmatprep.mubr.msk.f32.mxu1 %vm1389_vm4, %v1840_v41  ;;  %v2976_v36 = vld [vmem:[%s4302_s7 + $0x60] sm:$0xff]  ;;  %v2978_v41 = vld [vmem:[%s4302_s7 + $0x70] sm:$0xf] }
 0x1b7   :  { %3395 = vmatprep.subr.mxu1 %v2941_v27 }
 0x1ba   :  { %3396 = vmatpush3.msra.mxu1 %v2941_v27  ;;  %v3544_v27 = vpack.c.bf16 %v2977_v26, %v2976_v36 }
 0x1bb   :  { %3398 = vmatmul.mubr.msk.f32.vlgmr.msra.gmra.mrb[20].mxu1 %vm1389_vm4, %v1841_v45  ;;  %3524 = vmatprep.subr.bf16.mxu1 %v3523_v28  ;;  %v2983_v45 = vld [vmem:[%s4302_s7 + $0x88] sm:$0xf] }
 0x1bc   :  { %3400 = vmatprep.mubr.msk.f32.mxu1 %vm1389_vm4, %v1842_v46  ;;  %3526 = vmatpush3.bf16.msra.mxu1 %v3523_v28  ;;  %v2986_v28 = vld [vmem:[%s4302_s7 + $0x90] sm:$0xff] }
 0x1bd   :  { %3528 = vmatprep.subr.bf16.mxu1 %v3527_v44 }
 0x1bf   :  { %3401 = vmatmul.mubr.msk.f32.gmra.mrb[22].mxu1 %vm1389_vm4, %v1843_v29 }
 0x1c0   :  { %3530 = vmatpush3.bf16.msra.mxu1 %v3527_v44  ;;  %3413 = vmatprep.mubr.msk.f32.mxu1 %vm1389_vm4, %v1951_v48  ;;  %v2987_v44 = vld [vmem:[%s4302_s7 + $0x98] sm:$0xff]  ;;  %v2992_v48 = vld [vmem:[%s4302_s7 + $0xb0] sm:$0xff] }
 0x1c1   :  { %3411 = vmatprep.subr.mxu1 %v2950_v47  ;;  %v3550_v46 = vpack.c.bf16 %v2987_v44, %v2986_v28 }
 0x1c4   :  { %3412 = vmatpush3.msra.mxu1 %v2950_v47  ;;  %v2991_v47 = vld [vmem:[%s4302_s7 + $0xa8] sm:$0xff] }
 0x1c5   :  { %3414 = vmatmul.mubr.msk.f32.vlgmr.msra.gmra.mrb[20].mxu1 %vm1389_vm4, %v1952_v49  ;;  %3531 = vmatprep.subr.bf16.mxu1 %v3698_v54  ;;  %v2988_v49 = vld [vmem:[%s4302_s7 + $0xa0] sm:$0xf] }
 0x1c6   :  { %3416 = vmatprep.mubr.msk.f32.mxu1 %vm1389_vm4, %v1953_v50  ;;  %3533 = vmatpush3.bf16.msra.mxu1 %v3532_v55  ;;  %v3553_v50 = vpack.c.bf16 %v2992_v48, %v2991_v47 }
 0x1c7   :  { %3423 = vmatprep.subr.mxu1 %v3697_v2 }
 0x1c9   :  { %3417 = vmatmul.mubr.msk.f32.gmra.mrb[22].mxu1 %vm1389_vm4, %v1954_v51 }
 0x1ca   :  { %3425 = vmatprep.mubr.msk.f32.mxu1 %vm3699_vm9, %v3697_v2  ;;  %3424 = vmatpush3.msk.msra.mxu1 %vm182_vm0, %v2961_v56 }
 0x1cb   :  { %3534 = vmatprep.subr.bf16.mxu1 %v3698_v54 }
 0x298   :  { %v3415_v57 = vpop.f32.mrb[20].mxu1 }
 0x299   :  { %2064 = vst.msk [vmem:[#allocation5 + $0x8] sm:$0xff] %vm2062_vm10, %v3415_v57  ;;  %v2039_v58 = vpop.f32.mrb[21].mxu1 }
 0x29a   :  { %2063 = vst.msk [vmem:[#allocation5] sm:$0xff] %vm2062_vm10, %v2039_v58 }
 0x29c   :  { %v3418_v59 = vpop.f32.mrb[22].mxu1 }
 0x29d   :  { %2066 = vst.msk [vmem:[#allocation5 + $0x18] sm:$0xff] %vm2062_vm10, %v3418_v59  ;;  %v2049_v60 = vpop.f32.mrb[23].mxu1 }
 0x29e   :  { %2065 = vst.msk [vmem:[#allocation5 + $0x10] sm:$0xff] %vm2062_vm10, %v2049_v60 }
 0x2a1   :  { %v2067_v61 = vld [vmem:[#allocation5] ss:$2 sm:$0xff]  ;;  %v2071_v62 = vld [vmem:[#allocation5 + $0x1] ss:$2 sm:$0xff] }
 0x2a2   :  { %v2074_v1 = vmax.f32 %v2067_v61, %v2071_v62 }
 0x2a4   :  { %v2083_v4 = vmul.f32 %v2955_v0, %v2074_v1 }
 0x2a5   :  { %v2069_v6 = vld [vmem:[#allocation5 + $0x10] ss:$2 sm:$0xff]  ;;  %v2073_v7 = vld [vmem:[#allocation5 + $0x11] ss:$2 sm:$0xff] }
 0x2a6   :  { %v2092_v8 = vadd.f32 %v2956_v3, %v2083_v4  ;;  %v2075_v63 = vmax.f32 %v2069_v6, %v2073_v7 }
 0x2a8   :  { %v2096_v5 = vmul.f32 1.442695, %v2092_v8  ;;  %v2084_v9 = vmul.f32 %v2955_v0, %v2075_v63  ;;  %vm2094_vm11 = vcmp.gt.f32.partialorder %v2092_v8, 0.0 }
 0x2aa   :  { %3665 = vpow2.f32 %v2096_v5  ;;  %v2093_v10 = vadd.f32 %v2956_v3, %v2084_v9 }
 0x2ac   :  { %v2098_v11 = vmul.f32 1.442695, %v2093_v10  ;;  %vm2095_vm12 = vcmp.gt.f32.partialorder %v2093_v10, 0.0 }
 0x2ae   :  { %3667 = vpow2.f32 %v2098_v11  ;;  %v2996_v11 = vld [vmem:[%s4303_s8] ss:$0 sm:$0xff]  ;;  %s3673_s8 = scalar_lea.vmem %s2793_s17, 32 }
 0x2af   :  { %p3674_p0 = scmp.ne.s32.totalorder %s2793_s17, %s3673_s8  ;;  %p3679_p2 = scmp.lt.s32.totalorder %s3673_s8, %s3673_s8 }
 0x2b1   :  { %p3680_p3 = por %p3679_p2, %p3678_p1 }
 0x2b3   :  { %p3681_p4 = pnand %p3680_p3, %p3674_p0 }
 0x2b4   :  { %v3666_v25 = vpop.eup %3665 }
 0x2b5   :  { %v2957_v12 = vadd.f32 -1.0, %v3666_v25 }
 0x2b7   :  { %v2102_v13 = vsel %vm2094_vm11, %v2092_v8, %v2957_v12 }
 0x2b8   :  { %v3668_v14 = vpop.eup %3667  ;;  %2104 = vst.msk [vmem:[#allocation6] sm:$0xff] %vm2062_vm10, %v2102_v13 }
 0x2b9   :  { %v2958_v15 = vadd.f32 -1.0, %v3668_v14 }
 0x2bb   :  { %v2103_v16 = vsel %vm2095_vm12, %v2093_v10, %v2958_v15 }
 0x2bc   :  { %2105 = vst.msk [vmem:[#allocation6 + $0x8] sm:$0xff] %vm2062_vm10, %v2103_v16 }
 0x2c3   :  { %v2111_v20 = vld [vmem:[#allocation6 + $0x1] ss:$8 sm:$0x3]  ;;  %v2106_v21 = vld [vmem:[#allocation6] ss:$8 sm:$0x3] }
 0x2c4   :  { %3426 = vmatmul.mubr.msk.f32.vlgmr.msra.gmra.mrb[24].mxu1 %vm2062_vm10, %v2111_v20  ;;  %v2269_v35 = vld [vmem:[#allocation6 + $0x2] ss:$8 sm:$0x3]  ;;  %v2352_v38 = vld [vmem:[#allocation6 + $0x3] ss:$8 sm:$0x3] }
 0x2c5   :  { %3536 = vmatpush3.bf16.msra.mxu1 %v3535_v19  ;;  %3434 = vmatprep.mubr.msk.f32.mxu1 %vm3699_vm9, %v3697_v2  ;;  %v2435_v43 = vld [vmem:[#allocation6 + $0x4] ss:$8 sm:$0x3]  ;;  %v2518_v29 = vld [vmem:[#allocation6 + $0x5] ss:$8 sm:$0x3] }
 0x2c6   :  { %3432 = vmatprep.subr.mxu1 %v3697_v2  ;;  %v2601_v51 = vld [vmem:[#allocation6 + $0x6] ss:$8 sm:$0x3]  ;;  %v2684_v53 = vld [vmem:[#allocation6 + $0x7] ss:$8 sm:$0x3] }
 0x2c9   :  { %3433 = vmatpush3.msk.msra.mxu1 %vm182_vm0, %v2109_v30 }
 0x2ca   :  { %3435 = vmatmul.mubr.msk.f32.vlgmr.msra.gmra.mrb[26].mxu1 %vm2062_vm10, %v2106_v21  ;;  %3537 = vmatprep.subr.bf16.mxu1 %v3698_v54 }
 0x2cb   :  { %3539 = vmatpush3.bf16.msra.mxu1 %v3538_v31  ;;  %3443 = vmatprep.mubr.msk.f32.mxu1 %vm3699_vm9, %v3697_v2 }
 0x2cc   :  { %3441 = vmatprep.subr.mxu1 %v3697_v2 }
 0x2cf   :  { %3442 = vmatpush3.msk.msra.mxu1 %vm182_vm0, %v2968_v33 }
 0x2d0   :  { %3444 = vmatmul.mubr.msk.f32.vlgmr.msra.gmra.mrb[28].mxu1 %vm2062_vm10, %v2269_v35  ;;  %3540 = vmatprep.subr.bf16.mxu1 %v3698_v54 }
 0x2d1   :  { %3542 = vmatpush3.bf16.msra.mxu1 %v3541_v34  ;;  %3452 = vmatprep.mubr.msk.f32.mxu1 %vm3699_vm9, %v3697_v2 }
 0x2d2   :  { %3450 = vmatprep.subr.mxu1 %v3697_v2 }
 0x2d5   :  { %3451 = vmatpush3.msk.msra.mxu1 %vm182_vm0, %v2973_v37 }
 0x2d6   :  { %3453 = vmatmul.mubr.msk.f32.vlgmr.msra.gmra.mrb[30].mxu1 %vm2062_vm10, %v2352_v38  ;;  %3543 = vmatprep.subr.bf16.mxu1 %v3698_v54 }
 0x2d7   :  { %3545 = vmatpush3.bf16.msra.mxu1 %v3544_v27  ;;  %3461 = vmatprep.mubr.msk.f32.mxu1 %vm3699_vm9, %v3697_v2 }
 0x2d8   :  { %3459 = vmatprep.subr.mxu1 %v3697_v2 }
 0x2db   :  { %3460 = vmatpush3.msk.msra.mxu1 %vm182_vm0, %v2978_v41 }
 0x2dc   :  { %3462 = vmatmul.mubr.msk.f32.vlgmr.msra.gmra.mrb[32].mxu1 %vm2062_vm10, %v2435_v43  ;;  %3546 = vmatprep.subr.bf16.mxu1 %v3698_v54 }
 0x2dd   :  { %3548 = vmatpush3.bf16.msra.mxu1 %v3547_v42  ;;  %3470 = vmatprep.mubr.msk.f32.mxu1 %vm3699_vm9, %v3697_v2 }
 0x2de   :  { %3468 = vmatprep.subr.mxu1 %v3697_v2 }
 0x2e1   :  { %3469 = vmatpush3.msk.msra.mxu1 %vm182_vm0, %v2983_v45 }
 0x2e2   :  { %3471 = vmatmul.mubr.msk.f32.vlgmr.msra.gmra.mrb[34].mxu1 %vm2062_vm10, %v2518_v29  ;;  %3549 = vmatprep.subr.bf16.mxu1 %v3698_v54 }
 0x2e3   :  { %3551 = vmatpush3.bf16.msra.mxu1 %v3550_v46  ;;  %3479 = vmatprep.mubr.msk.f32.mxu1 %vm3699_vm9, %v3697_v2 }
 0x2e4   :  { %3477 = vmatprep.subr.mxu1 %v3697_v2 }
 0x2e7   :  { %3478 = vmatpush3.msk.msra.mxu1 %vm182_vm0, %v2988_v49 }
 0x2e8   :  { %3480 = vmatmul.mubr.msk.f32.vlgmr.msra.gmra.mrb[36].mxu1 %vm2062_vm10, %v2601_v51  ;;  %3552 = vmatprep.subr.bf16.mxu1 %v3698_v54 }
 0x2e9   :  { %3554 = vmatpush3.bf16.msra.mxu1 %v3553_v50  ;;  %3488 = vmatprep.mubr.msk.f32.mxu1 %vm3699_vm9, %v3697_v2 }
 0x2ea   :  { %3486 = vmatprep.subr.mxu1 %v3697_v2 }
 0x2ed   :  { %3487 = vmatpush3.msk.msra.mxu1 %vm182_vm0, %v2993_v52 }
 0x2ee   :  { %3489 = vmatmul.mubr.msk.f32.vlgmr.msra.gmra.mrb[38].mxu1 %vm2062_vm10, %v2684_v53 }
 0x397   :  { %v2188_v55 = vpop.f32.mrb[24].mxu1 }
 0x398   :  { %v3427_v56 = vpop.f32.mrb[25].mxu1 }
 0x39d   :  { %v2264_v57 = vpop.f32.mrb[26].mxu1 }
 0x39e   :  { %v2265_v58 = vadd.f32 %v2264_v57, %v2188_v55  ;;  %v3436_v54 = vpop.f32.mrb[27].mxu1 }
 0x3a3   :  { %v2346_v59 = vpop.f32.mrb[28].mxu1 }
 0x3a4   :  { %v2350_v60 = vadd.f32 %v2346_v59, %v2265_v58  ;;  %v3445_v61 = vpop.f32.mrb[29].mxu1 }
 0x3a9   :  { %v2429_v62 = vpop.f32.mrb[30].mxu1 }
 0x3aa   :  { %v2433_v0 = vadd.f32 %v2429_v62, %v2350_v60  ;;  %v3454_v2 = vpop.f32.mrb[31].mxu1 }
 0x3af   :  { %v2512_v1 = vpop.f32.mrb[32].mxu1 }
 0x3b0   :  { %v2516_v3 = vadd.f32 %v2512_v1, %v2433_v0  ;;  %v3463_v4 = vpop.f32.mrb[33].mxu1 }
 0x3b5   :  { %v2595_v6 = vpop.f32.mrb[34].mxu1 }
 0x3b6   :  { %v2599_v7 = vadd.f32 %v2595_v6, %v2516_v3  ;;  %v3472_v8 = vpop.f32.mrb[35].mxu1 }
 0x3bb   :  { %v2678_v63 = vpop.f32.mrb[36].mxu1 }
 0x3bc   :  { %v2682_v5 = vadd.f32 %v2678_v63, %v2599_v7  ;;  %v3481_v9 = vpop.f32.mrb[37].mxu1 }
 0x3c1   :  { %v2761_v10 = vpop.f32.mrb[38].mxu1 }
 0x3c2   :  { %v2765_v25 = vadd.f32 %v2761_v10, %v2682_v5  ;;  %v3490_v12 = vpop.f32.mrb[39].mxu1 }
 0x3c4   :  { %v2773_v13 = vadd.f32 %v2996_v11, %v2765_v25 }
 0x3c6   :  { %v2774_v14 = vsel %vm33_vm1, %v2773_v13, -inf }
 0x3c7   :  { %2775 = vmax.xlane.f32.xlu0 %v2774_v14 }
 0x454   :  { %v2776_v15 = vpop.xlane.xlu0 %2775 }
 0x455   :  { %v2777_v16 = vsub.f32 %v2773_v13, %v2776_v15 }
 0x457   :  { %v2778_v17 = vmul.f32 1.442695, %v2777_v16 }
 0x459   :  { %3669 = vpow2.f32 %v2778_v17 }
 0x463   :  { %v3670_v18 = vpop.eup %3669 }
 0x464   :  { %v2780_v19 = vsel %vm33_vm1, %v3670_v18, 0.0 }
 0x465   :  { %2781 = vadd.xlane.f32.xlu0 %v2780_v19 }
 0x4f2   :  { %v2782_v20 = vpop.xlane.xlu0 %2781 }
 0x4f3   :  { %3671 = vrcp.f32 %v2782_v20 }
 0x4fd   :  { %v3672_v23 = vpop.eup %3671 }
 0x4fe   :  { %v2784_v24 = vmul.f32 %v3672_v23, %v3670_v18 }
 0x500   :  { %2785 = vst.msk [vmem:[#allocation7] sm:$0x3] %vm33_vm1, %v2784_v24 }
 0x501   :  { %3684 = shalt.err (!%p3681_p4)
}
 0x502   :  { %s3685_s20 = scalar_lea.hbm %s4304_s9, 32 }
 0x503   :  { %p3686_p5 = scmp.ne.s32.totalorder %s4304_s9, %s3685_s20  ;;  %p3689_p6 = scmp.lt.u32.totalorder %s3685_s20, %s4304_s9 }
 0x505   :  { %p3691_p7 = pnand %p3689_p6, %p3686_p5 }
 0x507   :  { %3694 = shalt.err (!%p3691_p7)
}
 0x508   :  { %2795 = dma.vmem_to_hbm [thread:$0]  %s2793_s17, 32, %s4304_s9, [#allocation8]  }
 0x509   :  { %3695 = dma.done.wait [#allocation8], 32  }
 0x50a   :  { %3696 = vsyncadd [#allocation8], 4294967264 }
 0x50b   :  { %2799 = vsyncpa [#allocation8], 1 }

</bundles_post_ra>
